<compile_context>
chip_gen: v7x
topology: tpu7x:2x2x1
jax: 0.10.0
libtpu: 0.0.40
codegen_flags: <defaults>
</compile_context>

<pallas_src>
import math
from functools import partial

import jax
import jax.numpy as jnp
from jax import lax
from jax.experimental import pallas as pl
from jax.experimental.pallas import tpu as pltpu

LN_EPS = 1e-5                      # PyTorch nn.LayerNorm default
VMEM_LIMIT = 64 * 1024 * 1024      # explicit budget; <= physical VMEM on v5e/v6e/v7x


def _layernorm(h, g, b):
    mu = jnp.mean(h, axis=-1, keepdims=True)
    var = jnp.mean(jnp.square(h - mu), axis=-1, keepdims=True)
    return (h - mu) * lax.rsqrt(var + LN_EPS) * g + b


# --------------------------- transformer block kernel --------------------------- #

def _block_kernel(x_ref, ln1g_ref, ln1b_ref, wqkv_ref, bqkv_ref, wp3_ref, bp_ref,
                  ln2g_ref, ln2b_ref, w1_ref, b1_ref, w2_ref, b2_ref, o_ref):
    _, T, C = x_ref.shape
    H, _, D3 = wqkv_ref.shape
    Dh = D3 // 3
    cdt = wqkv_ref.dtype                       # bf16 compute dtype for MXU operands

    x = x_ref[0]                               # (T, C) f32 residual stream

    # ---- attention branch: LN1 -> fused per-head QKV -> causal softmax -> AV -> proj
    h = _layernorm(x, ln1g_ref[...], ln1b_ref[...])
    # leading-dim broadcast only (cheap, fully supported); all heads in one batched dot
    hb = jnp.broadcast_to(h.astype(cdt)[None], (H, T, C))
    qkv = lax.dot_general(hb, wqkv_ref[...], (((2,), (1,)), ((0,), (0,))),
                          preferred_element_type=jnp.float32) + bqkv_ref[...]  # (H,T,3Dh)
    q = qkv[:, :, 0 * Dh:1 * Dh].astype(cdt)   # 1/sqrt(Dh) already folded into wqkv/bqkv
    k = qkv[:, :, 1 * Dh:2 * Dh].astype(cdt)
    v = qkv[:, :, 2 * Dh:3 * Dh].astype(cdt)

    att = lax.dot_general(q, k, (((2,), (2,)), ((0,), (0,))),
                          preferred_element_type=jnp.float32)                  # (H,T,T)
    row = lax.broadcasted_iota(jnp.int32, (T, T), 0)
    col = lax.broadcasted_iota(jnp.int32, (T, T), 1)
    att = jnp.where((col <= row)[None], att, -jnp.inf)       # causal mask
    att = att - jnp.max(att, axis=-1, keepdims=True)
    p = jnp.exp(att)
    p = p * pl.reciprocal(jnp.sum(p, axis=-1, keepdims=True), approx=True)     # EUP slot

    y = lax.dot_general(p.astype(cdt), v, (((2,), (1,)), ((0,), (0,))),
                        preferred_element_type=jnp.float32)                    # (H,T,Dh)
    # head-merge folded into the output projection: concat(heads) @ Wp == sum_h y_h @ Wp_h
    proj = lax.dot_general(y.astype(cdt), wp3_ref[...], (((2,), (1,)), ((0,), (0,))),
                           preferred_element_type=jnp.float32)                 # (H,T,C)
    x = x + jnp.sum(proj, axis=0) + bp_ref[...]              # residual 1 (resid_pdrop=0)

    # ---- MLP branch
    h2 = _layernorm(x, ln2g_ref[...], ln2b_ref[...]).astype(cdt)
    # TODO(synk): PyTorch nn.GELU() defaults to the exact erf form; tanh approximation
    # used here (max abs diff ~3e-4) for portable Mosaic lowering.
    m = jax.nn.gelu(jnp.dot(h2, w1_ref[...], preferred_element_type=jnp.float32)
                    + b1_ref[...], approximate=True)
    m = jnp.dot(m.astype(cdt), w2_ref[...], preferred_element_type=jnp.float32) + b2_ref[...]
    o_ref[0] = x + m                                         # residual 2


def transformer_block(x, p):
    B, T, C = x.shape
    # weights: whole-array VMEM residency (single copy, DMA'd once, NOT double-buffered)
    wspec = pl.BlockSpec(memory_space=pltpu.MemorySpace.VMEM)
    weights = (p['ln1_g'], p['ln1_b'], p['wqkv'], p['bqkv'], p['wp3'], p['bp'],
               p['ln2_g'], p['ln2_b'], p['w1'], p['b1'], p['w2'], p['b2'])
    return pl.pallas_call(
        _block_kernel,
        grid=(B,),
        out_shape=jax.ShapeDtypeStruct((B, T, C), jnp.float32),
        in_specs=[pl.BlockSpec((1, T, C), lambda b: (b, 0, 0))] + [wspec] * len(weights),
        out_specs=pl.BlockSpec((1, T, C), lambda b: (b, 0, 0)),
        compiler_params=pltpu.CompilerParams(
            dimension_semantics=("parallel",),          # megacore over batch on v7x
            vmem_limit_bytes=VMEM_LIMIT),
    )(x, *weights)


# --------------------------- final LayerNorm + vocab head --------------------------- #

def _head_kernel(x_ref, g_ref, b_ref, wh_ref, o_ref):
    h = _layernorm(x_ref[...], g_ref[...], b_ref[...])          # recomputed per vocab tile
    o_ref[...] = jnp.dot(h.astype(wh_ref.dtype), wh_ref[...],
                         preferred_element_type=jnp.float32)


def _pick_tile(n, preferred, quantum):
    t = min(preferred, n)
    while t >= quantum:
        if n % t == 0:
            return t
        t //= 2
    return n   # full extent (always a legal block size)


def lnf_head(x, lnf_g, lnf_b, w_head):
    B, T, C = x.shape
    V = w_head.shape[1]
    N = B * T
    x2 = x.reshape(N, C)
    tm = _pick_tile(N, 256, 8)
    tv = _pick_tile(V, 1024, 128)        # lane-dense output tiles, w_head streamed from HBM
    out = pl.pallas_call(
        _head_kernel,
        grid=(N // tm, V // tv),
        out_shape=jax.ShapeDtypeStruct((N, V), jnp.float32),
        in_specs=[pl.BlockSpec((tm, C), lambda i, j: (i, 0)),
                  pl.BlockSpec(memory_space=pltpu.MemorySpace.VMEM),
                  pl.BlockSpec(memory_space=pltpu.MemorySpace.VMEM),
                  pl.BlockSpec((C, tv), lambda i, j: (0, j))],
        out_specs=pl.BlockSpec((tm, tv), lambda i, j: (i, j)),
        compiler_params=pltpu.CompilerParams(
            dimension_semantics=("parallel", "parallel"),
            vmem_limit_bytes=VMEM_LIMIT),
    )(x2, lnf_g, lnf_b, w_head)
    return out.reshape(B, T, V)


# --------------------------- full forward --------------------------- #

def sharded_gpt_forward(idx, params, config):
    B, T = idx.shape
    assert T <= config['block_size'], 'Cannot forward, model block size is exhausted.'
    # EmbeddingStem: token gather + positional slice (glue, plain JAX); embd_pdrop=0
    x = params['tok_emb'][idx] + params['pos_emb'][:, :T, :]
    # TODO(synk): cross-pallas_call prefetch of layer l+1 weights (P10) or a fused
    # layer-grid kernel with stacked (L, ...) weights would hide per-layer weight DMA.
    for blk in params['blocks']:
        x = transformer_block(x, blk)
    return lnf_head(x, params['lnf_g'], params['lnf_b'], params['w_head'])


# --------------------------- parameters --------------------------- #

def init_raw_params(key, config):
    """PyTorch-equivalent init, f32, weights stored as (in, out) so y = x @ W + b."""
    V, C = config['vocab_size'], config['n_embd']
    L, BS = config['n_layer'], config['block_size']
    keys = jax.random.split(key, 2 + L)
    params = {
        'tok_emb': jax.random.normal(keys[0], (V, C), jnp.float32),   # nn.Embedding: N(0,1)
        'pos_emb': jnp.zeros((1, BS, C), jnp.float32),                # torch.zeros
    }

    def linear(k, fi, fo, bias=True):
        kw, kb = jax.random.split(k)
        bound = 1.0 / math.sqrt(fi)          # nn.Linear default U(-1/sqrt(fan_in), ...)
        W = jax.random.uniform(kw, (fi, fo), jnp.float32, -bound, bound)
        b = jax.random.uniform(kb, (1, fo), jnp.float32, -bound, bound) if bias else None
        return W, b

    blocks = []
    for l in range(L):
        bk = jax.random.split(keys[2 + l], 6)
        wq, bq = linear(bk[0], C, C)
        wk, bkk = linear(bk[1], C, C)
        wv, bv = linear(bk[2], C, C)
        wp, bp = linear(bk[3], C, C)
        w1, b1 = linear(bk[4], C, 4 * C)
        w2, b2 = linear(bk[5], 4 * C, C)
        blocks.append(dict(
            ln1_g=jnp.ones((1, C), jnp.float32), ln1_b=jnp.zeros((1, C), jnp.float32),
            wq=wq, bq=bq, wk=wk, bk=bkk, wv=wv, bv=bv, wp=wp, bp=bp,
            ln2_g=jnp.ones((1, C), jnp.float32), ln2_b=jnp.zeros((1, C), jnp.float32),
            w1=w1, b1=b1, w2=w2, b2=b2))
    params['blocks'] = blocks
    params['lnf_g'] = jnp.ones((1, C), jnp.float32)
    params['lnf_b'] = jnp.zeros((1, C), jnp.float32)
    params['w_head'], _ = linear(keys[1], C, V, bias=False)
    return params


def prepare_kernel_params(raw, config, weight_dtype=jnp.bfloat16):
    """Fuse / reshape / scale-fold weights for the kernels; cast weights to bf16."""
    C, H = config['n_embd'], config['n_head']
    Dh = C // H
    scale = 1.0 / math.sqrt(Dh)

    def per_head_cols(w):            # (C, C) -> (H, C, Dh): head h's output columns
        return jnp.transpose(w.reshape(C, H, Dh), (1, 0, 2))

    kblocks = []
    for blk in raw['blocks']:
        wqkv = jnp.concatenate([per_head_cols(blk['wq']) * scale,      # scale folded into q
                                per_head_cols(blk['wk']),
                                per_head_cols(blk['wv'])], axis=-1)    # (H, C, 3Dh)
        bqkv = jnp.concatenate([blk['bq'].reshape(H, 1, Dh) * scale,
                                blk['bk'].reshape(H, 1, Dh),
                                blk['bv'].reshape(H, 1, Dh)], axis=-1)  # (H, 1, 3Dh) f32
        kblocks.append(dict(
            ln1_g=blk['ln1_g'], ln1_b=blk['ln1_b'],
            wqkv=wqkv.astype(weight_dtype), bqkv=bqkv,
            wp3=blk['wp'].reshape(H, Dh, C).astype(weight_dtype), bp=blk['bp'],
            ln2_g=blk['ln2_g'], ln2_b=blk['ln2_b'],
            w1=blk['w1'].astype(weight_dtype), b1=blk['b1'],
            w2=blk['w2'].astype(weight_dtype), b2=blk['b2']))
    return dict(tok_emb=raw['tok_emb'], pos_emb=raw['pos_emb'], blocks=kblocks,
                lnf_g=raw['lnf_g'], lnf_b=raw['lnf_b'],
                w_head=raw['w_head'].astype(weight_dtype))


# --------------------------- pure-JAX reference (f32) --------------------------- #

def forward_reference(idx, raw, config):
    B, T = idx.shape
    C, H = config['n_embd'], config['n_head']
    Dh = C // H
    x = raw['tok_emb'][idx] + raw['pos_emb'][:, :T, :]
    mask = jnp.tril(jnp.ones((T, T), dtype=bool))
    for blk in raw['blocks']:
        h = _layernorm(x, blk['ln1_g'], blk['ln1_b'])
        q = (h @ blk['wq'] + blk['bq']).reshape(B, T, H, Dh).transpose(0, 2, 1, 3)
        k = (h @ blk['wk'] + blk['bk']).reshape(B, T, H, Dh).transpose(0, 2, 1, 3)
        v = (h @ blk['wv'] + blk['bv']).reshape(B, T, H, Dh).transpose(0, 2, 1, 3)
        att = jnp.einsum('bhtd,bhsd->bhts', q, k) / math.sqrt(Dh)
        att = jnp.where(mask, att, -jnp.inf)
        att = jax.nn.softmax(att, axis=-1)
        y = jnp.einsum('bhts,bhsd->bhtd', att, v).transpose(0, 2, 1, 3).reshape(B, T, C)
        x = x + y @ blk['wp'] + blk['bp']
        h2 = _layernorm(x, blk['ln2_g'], blk['ln2_b'])
        x = x + jax.nn.gelu(h2 @ blk['w1'] + blk['b1'], approximate=True) @ blk['w2'] + blk['b2']
    x = _layernorm(x, raw['lnf_g'], raw['lnf_b'])
    return x @ raw['w_head']


if __name__ == "__main__":
    # lane/sublane-aligned toy config (C, V multiples of 128; T multiple of 8)
    config = dict(vocab_size=256, block_size=8, n_embd=128, n_head=4, n_layer=2,
                  attn_pdrop=0.0, resid_pdrop=0.0, embd_pdrop=0.0)
    key = jax.random.PRNGKey(0)
    kp, ki = jax.random.split(key)
    raw = init_raw_params(kp, config)
    kparams = prepare_kernel_params(raw, config)

    B, T = 2, config['block_size']
    idx = jax.random.randint(ki, (B, T), 0, config['vocab_size'], dtype=jnp.int32)

    fwd = jax.jit(partial(sharded_gpt_forward, config=config))
    logits = fwd(idx, kparams)
    jax.block_until_ready(logits)

    assert logits.shape == (B, T, config['vocab_size'])
    assert bool(jnp.all(jnp.isfinite(logits)))

    # sanity check vs. pure-JAX f32 reference (bf16 weights + approx reciprocal => loose tol)
    ref = forward_reference(idx, raw, config)
    max_err = float(jnp.max(jnp.abs(logits - ref)))
    assert max_err < 0.15, f"kernel deviates from reference: max_err={max_err}"
    print("KERNEL_OK")
</pallas_src>

<mosaic_0001>
module attributes {stable_mosaic.version = 11 : i64} {
  func.func @_head_kernel(%arg0: i32, %arg1: i32, %arg2: memref<16x128xf32, #tpu.memory_space<vmem>>, %arg3: memref<1x128xf32, #tpu.memory_space<vmem>>, %arg4: memref<1x128xf32, #tpu.memory_space<vmem>>, %arg5: memref<128x256xbf16, #tpu.memory_space<vmem>>, %arg6: memref<16x256xf32, #tpu.memory_space<vmem>>) attributes {dimension_semantics = [#tpu.dimension_semantics<parallel>, #tpu.dimension_semantics<parallel>], iteration_bounds = array<i64: 1, 1>, scalar_prefetch = 0 : i64, scratch_operands = 0 : i64, tpu.core_type = #tpu.core_type<tc>, window_params = [{transform_indices = @transform_0, window_bounds = array<i64: 16, 128>}, {pipeline_mode = #tpu.pipeline_mode<synchronous>, transform_indices = @transform_1, window_bounds = array<i64: 1, 128>}, {pipeline_mode = #tpu.pipeline_mode<synchronous>, transform_indices = @transform_2, window_bounds = array<i64: 1, 128>}, {transform_indices = @transform_3, window_bounds = array<i64: 128, 256>}, {transform_indices = @transform_4, window_bounds = array<i64: 16, 256>}]} {
    %c0 = arith.constant 0 : index
    %c0_0 = arith.constant 0 : index
    %0 = vector.load %arg2[%c0, %c0_0] : memref<16x128xf32, #tpu.memory_space<vmem>>, vector<16x128xf32>
    %c0_1 = arith.constant 0 : index
    %c0_2 = arith.constant 0 : index
    %1 = vector.load %arg3[%c0_1, %c0_2] : memref<1x128xf32, #tpu.memory_space<vmem>>, vector<1x128xf32>
    %c0_3 = arith.constant 0 : index
    %c0_4 = arith.constant 0 : index
    %2 = vector.load %arg4[%c0_3, %c0_4] : memref<1x128xf32, #tpu.memory_space<vmem>>, vector<1x128xf32>
    %cst = arith.constant dense<0.000000e+00> : vector<16xf32>
    %3 = vector.multi_reduction <add>, %0, %cst [1] : vector<16x128xf32> to vector<16xf32>
    %4 = vector.shape_cast %3 : vector<16xf32> to vector<16x1xf32>
    %cst_5 = arith.constant 1.280000e+02 : f32
    %5 = vector.broadcast %cst_5 : f32 to vector<16x1xf32>
    %6 = arith.divf %4, %5 : vector<16x1xf32>
    %7 = vector.broadcast %6 : vector<16x1xf32> to vector<16x128xf32>
    %8 = arith.subf %0, %7 : vector<16x128xf32>
    %9 = arith.mulf %8, %8 : vector<16x128xf32>
    %cst_6 = arith.constant dense<0.000000e+00> : vector<16xf32>
    %10 = vector.multi_reduction <add>, %9, %cst_6 [1] : vector<16x128xf32> to vector<16xf32>
    %11 = vector.shape_cast %10 : vector<16xf32> to vector<16x1xf32>
    %cst_7 = arith.constant 1.280000e+02 : f32
    %12 = vector.broadcast %cst_7 : f32 to vector<16x1xf32>
    %13 = arith.divf %11, %12 : vector<16x1xf32>
    %14 = vector.broadcast %6 : vector<16x1xf32> to vector<16x128xf32>
    %15 = arith.subf %0, %14 : vector<16x128xf32>
    %cst_8 = arith.constant 9.99999974E-6 : f32
    %16 = vector.broadcast %cst_8 : f32 to vector<16x1xf32>
    %17 = arith.addf %13, %16 : vector<16x1xf32>
    %18 = math.rsqrt %17 : vector<16x1xf32>
    %19 = vector.broadcast %18 : vector<16x1xf32> to vector<16x128xf32>
    %20 = arith.mulf %15, %19 : vector<16x128xf32>
    %21 = vector.broadcast %1 : vector<1x128xf32> to vector<16x128xf32>
    %22 = arith.mulf %20, %21 : vector<16x128xf32>
    %23 = vector.broadcast %2 : vector<1x128xf32> to vector<16x128xf32>
    %24 = arith.addf %22, %23 : vector<16x128xf32>
    %25 = arith.truncf %24 : vector<16x128xf32> to vector<16x128xbf16>
    %c0_9 = arith.constant 0 : index
    %c0_10 = arith.constant 0 : index
    %26 = vector.load %arg5[%c0_9, %c0_10] : memref<128x256xbf16, #tpu.memory_space<vmem>>, vector<128x256xbf16>
    %cst_11 = arith.constant dense<0.000000e+00> : vector<16x256xf32>
    %27 = tpu.matmul %25, %26, %cst_11 {dimension_numbers = #tpu.dot_dimension_numbers<[1], [0], [0], [1], [0, 0, 1, 1], [], []>} : vector<16x128xbf16>, vector<128x256xbf16>, vector<16x256xf32> -> vector<16x256xf32>
    %c0_12 = arith.constant 0 : index
    %c0_13 = arith.constant 0 : index
    %28 = vector.load %arg6[%c0_12, %c0_13] : memref<16x256xf32, #tpu.memory_space<vmem>>, vector<16x256xf32>
    tpu.vector_store %arg6[%c0_12, %c0_13], %27 {strides = array<i32>} : memref<16x256xf32, #tpu.memory_space<vmem>>, vector<16x256xf32>,
    return
  }
  func.func @transform_0(%arg0: i32, %arg1: i32) -> (i32, i32) {
    %c0_i32 = arith.constant 0 : i32
    %c0_i32_0 = arith.constant 0 : i32
    return %arg0, %c0_i32 : i32, i32
  }
  func.func @transform_1(%arg0: i32, %arg1: i32) -> (i32, i32) {
    %c0_i32 = arith.constant 0 : i32
    %c0_i32_0 = arith.constant 0 : i32
    %c0_i32_1 = arith.constant 0 : i32
    return %c0_i32, %c0_i32_0 : i32, i32
  }
  func.func @transform_2(%arg0: i32, %arg1: i32) -> (i32, i32) {
    %c0_i32 = arith.constant 0 : i32
    %c0_i32_0 = arith.constant 0 : i32
    %c0_i32_1 = arith.constant 0 : i32
    return %c0_i32, %c0_i32_0 : i32, i32
  }
  func.func @transform_3(%arg0: i32, %arg1: i32) -> (i32, i32) {
    %c0_i32 = arith.constant 0 : i32
    %c0_i32_0 = arith.constant 0 : i32
    return %c0_i32, %arg1 : i32, i32
  }
  func.func @transform_4(%arg0: i32, %arg1: i32) -> (i32, i32) {
    %c0_i32 = arith.constant 0 : i32
    return %arg0, %arg1 : i32, i32
  }
}

module attributes {stable_mosaic.version = 11 : i64} {
  func.func @_block_kernel(%arg0: i32, %arg1: memref<1x8x128xf32, #tpu.memory_space<vmem>>, %arg2: memref<1x128xf32, #tpu.memory_space<vmem>>, %arg3: memref<1x128xf32, #tpu.memory_space<vmem>>, %arg4: memref<4x128x96xbf16, #tpu.memory_space<vmem>>, %arg5: memref<4x1x96xf32, #tpu.memory_space<vmem>>, %arg6: memref<4x32x128xbf16, #tpu.memory_space<vmem>>, %arg7: memref<1x128xf32, #tpu.memory_space<vmem>>, %arg8: memref<1x128xf32, #tpu.memory_space<vmem>>, %arg9: memref<1x128xf32, #tpu.memory_space<vmem>>, %arg10: memref<128x512xbf16, #tpu.memory_space<vmem>>, %arg11: memref<1x512xf32, #tpu.memory_space<vmem>>, %arg12: memref<512x128xbf16, #tpu.memory_space<vmem>>, %arg13: memref<1x128xf32, #tpu.memory_space<vmem>>, %arg14: memref<1x8x128xf32, #tpu.memory_space<vmem>>) attributes {dimension_semantics = [#tpu.dimension_semantics<parallel>], iteration_bounds = array<i64: 2>, scalar_prefetch = 0 : i64, scratch_operands = 0 : i64, tpu.core_type = #tpu.core_type<tc>, window_params = [{transform_indices = @transform_0, window_bounds = array<i64: 1, 8, 128>}, {pipeline_mode = #tpu.pipeline_mode<synchronous>, transform_indices = @transform_1, window_bounds = array<i64: 1, 128>}, {pipeline_mode = #tpu.pipeline_mode<synchronous>, transform_indices = @transform_2, window_bounds = array<i64: 1, 128>}, {pipeline_mode = #tpu.pipeline_mode<synchronous>, transform_indices = @transform_3, window_bounds = array<i64: 4, 128, 96>}, {pipeline_mode = #tpu.pipeline_mode<synchronous>, transform_indices = @transform_4, window_bounds = array<i64: 4, 1, 96>}, {pipeline_mode = #tpu.pipeline_mode<synchronous>, transform_indices = @transform_5, window_bounds = array<i64: 4, 32, 128>}, {pipeline_mode = #tpu.pipeline_mode<synchronous>, transform_indices = @transform_6, window_bounds = array<i64: 1, 128>}, {pipeline_mode = #tpu.pipeline_mode<synchronous>, transform_indices = @transform_7, window_bounds = array<i64: 1, 128>}, {pipeline_mode = #tpu.pipeline_mode<synchronous>, transform_indices = @transform_8, window_bounds = array<i64: 1, 128>}, {pipeline_mode = #tpu.pipeline_mode<synchronous>, transform_indices = @transform_9, window_bounds = array<i64: 128, 512>}, {pipeline_mode = #tpu.pipeline_mode<synchronous>, transform_indices = @transform_10, window_bounds = array<i64: 1, 512>}, {pipeline_mode = #tpu.pipeline_mode<synchronous>, transform_indices = @transform_11, window_bounds = array<i64: 512, 128>}, {pipeline_mode = #tpu.pipeline_mode<synchronous>, transform_indices = @transform_12, window_bounds = array<i64: 1, 128>}, {transform_indices = @transform_13, window_bounds = array<i64: 1, 8, 128>}]} {
    %c0 = arith.constant 0 : index
    %c0_0 = arith.constant 0 : index
    %c0_1 = arith.constant 0 : index
    %0 = vector.load %arg1[%c0, %c0_0, %c0_1] : memref<1x8x128xf32, #tpu.memory_space<vmem>>, vector<1x8x128xf32>
    %1 = vector.shape_cast %0 : vector<1x8x128xf32> to vector<8x128xf32>
    %c0_2 = arith.constant 0 : index
    %c0_3 = arith.constant 0 : index
    %2 = vector.load %arg2[%c0_2, %c0_3] : memref<1x128xf32, #tpu.memory_space<vmem>>, vector<1x128xf32>
    %c0_4 = arith.constant 0 : index
    %c0_5 = arith.constant 0 : index
    %3 = vector.load %arg3[%c0_4, %c0_5] : memref<1x128xf32, #tpu.memory_space<vmem>>, vector<1x128xf32>
    %cst = arith.constant dense<0.000000e+00> : vector<8xf32>
    %4 = vector.multi_reduction <add>, %1, %cst [1] : vector<8x128xf32> to vector<8xf32>
    %5 = vector.shape_cast %4 : vector<8xf32> to vector<8x1xf32>
    %cst_6 = arith.constant 1.280000e+02 : f32
    %6 = vector.broadcast %cst_6 : f32 to vector<8x1xf32>
    %7 = arith.divf %5, %6 : vector<8x1xf32>
    %8 = vector.broadcast %7 : vector<8x1xf32> to vector<8x128xf32>
    %9 = arith.subf %1, %8 : vector<8x128xf32>
    %10 = arith.mulf %9, %9 : vector<8x128xf32>
    %cst_7 = arith.constant dense<0.000000e+00> : vector<8xf32>
    %11 = vector.multi_reduction <add>, %10, %cst_7 [1] : vector<8x128xf32> to vector<8xf32>
    %12 = vector.shape_cast %11 : vector<8xf32> to vector<8x1xf32>
    %cst_8 = arith.constant 1.280000e+02 : f32
    %13 = vector.broadcast %cst_8 : f32 to vector<8x1xf32>
    %14 = arith.divf %12, %13 : vector<8x1xf32>
    %15 = vector.broadcast %7 : vector<8x1xf32> to vector<8x128xf32>
    %16 = arith.subf %1, %15 : vector<8x128xf32>
    %cst_9 = arith.constant 9.99999974E-6 : f32
    %17 = vector.broadcast %cst_9 : f32 to vector<8x1xf32>
    %18 = arith.addf %14, %17 : vector<8x1xf32>
    %19 = math.rsqrt %18 : vector<8x1xf32>
    %20 = vector.broadcast %19 : vector<8x1xf32> to vector<8x128xf32>
    %21 = arith.mulf %16, %20 : vector<8x128xf32>
    %22 = vector.broadcast %2 : vector<1x128xf32> to vector<8x128xf32>
    %23 = arith.mulf %21, %22 : vector<8x128xf32>
    %24 = vector.broadcast %3 : vector<1x128xf32> to vector<8x128xf32>
    %25 = arith.addf %23, %24 : vector<8x128xf32>
    %26 = arith.truncf %25 : vector<8x128xf32> to vector<8x128xbf16>
    %27 = vector.shape_cast %26 : vector<8x128xbf16> to vector<1x8x128xbf16>
    %28 = vector.shape_cast %27 : vector<1x8x128xbf16> to vector<1x8x128xbf16>
    %29 = vector.broadcast %28 : vector<1x8x128xbf16> to vector<4x8x128xbf16>
    %c0_10 = arith.constant 0 : index
    %c0_11 = arith.constant 0 : index
    %c0_12 = arith.constant 0 : index
    %30 = vector.load %arg4[%c0_10, %c0_11, %c0_12] : memref<4x128x96xbf16, #tpu.memory_space<vmem>>, vector<4x128x96xbf16>
    %cst_13 = arith.constant dense<0.000000e+00> : vector<4x8x96xf32>
    %31 = tpu.matmul %29, %30, %cst_13 {dimension_numbers = #tpu.dot_dimension_numbers<[2], [1], [1], [2], [0, 0, 0, 1, 1, 2], [0], [0]>} : vector<4x8x128xbf16>, vector<4x128x96xbf16>, vector<4x8x96xf32> -> vector<4x8x96xf32>
    %c0_14 = arith.constant 0 : index
    %c0_15 = arith.constant 0 : index
    %c0_16 = arith.constant 0 : index
    %32 = vector.load %arg5[%c0_14, %c0_15, %c0_16] : memref<4x1x96xf32, #tpu.memory_space<vmem>>, vector<4x1x96xf32>
    %33 = vector.broadcast %32 : vector<4x1x96xf32> to vector<4x8x96xf32>
    %34 = arith.addf %31, %33 : vector<4x8x96xf32>
    %35 = vector.extract_strided_slice %34 {offsets = [0, 0, 0], sizes = [4, 8, 32], strides = [1, 1, 1]} : vector<4x8x96xf32> to vector<4x8x32xf32>
    %36 = arith.truncf %35 : vector<4x8x32xf32> to vector<4x8x32xbf16>
    %37 = vector.extract_strided_slice %34 {offsets = [0, 0, 32], sizes = [4, 8, 32], strides = [1, 1, 1]} : vector<4x8x96xf32> to vector<4x8x32xf32>
    %38 = arith.truncf %37 : vector<4x8x32xf32> to vector<4x8x32xbf16>
    %39 = vector.extract_strided_slice %34 {offsets = [0, 0, 64], sizes = [4, 8, 32], strides = [1, 1, 1]} : vector<4x8x96xf32> to vector<4x8x32xf32>
    %40 = arith.truncf %39 : vector<4x8x32xf32> to vector<4x8x32xbf16>
    %cst_17 = arith.constant dense<0.000000e+00> : vector<4x8x8xf32>
    %41 = tpu.matmul %36, %38, %cst_17 {dimension_numbers = #tpu.dot_dimension_numbers<[2], [2], [1], [1], [0, 0, 0, 1, 1, 1], [0], [0]>} : vector<4x8x32xbf16>, vector<4x8x32xbf16>, vector<4x8x8xf32> -> vector<4x8x8xf32>
    %42 = tpu.iota {dimensions = array<i32: 0>} : vector<8x8xi32>
    %43 = tpu.iota {dimensions = array<i32: 1>} : vector<8x8xi32>
    %44 = arith.cmpi sle, %43, %42 : vector<8x8xi32>
    %45 = vector.shape_cast %44 : vector<8x8xi1> to vector<1x8x8xi1>
    %cst_18 = arith.constant 0xFF800000 : f32
    %46 = vector.shape_cast %45 : vector<1x8x8xi1> to vector<1x8x8xi1>
    %47 = vector.broadcast %46 : vector<1x8x8xi1> to vector<4x8x8xi1>
    %48 = vector.broadcast %cst_18 : f32 to vector<4x8x8xf32>
    %49 = arith.select %47, %41, %48 : vector<4x8x8xi1>, vector<4x8x8xf32>
    %cst_19 = arith.constant dense<0xFF800000> : vector<4x8xf32>
    %50 = vector.multi_reduction <maximumf>, %49, %cst_19 [2] : vector<4x8x8xf32> to vector<4x8xf32>
    %51 = vector.shape_cast %50 : vector<4x8xf32> to vector<4x8x1xf32>
    %52 = vector.broadcast %51 : vector<4x8x1xf32> to vector<4x8x8xf32>
    %53 = arith.subf %49, %52 : vector<4x8x8xf32>
    %54 = math.exp %53 : vector<4x8x8xf32>
    %cst_20 = arith.constant dense<0.000000e+00> : vector<4x8xf32>
    %55 = vector.multi_reduction <add>, %54, %cst_20 [2] : vector<4x8x8xf32> to vector<4x8xf32>
    %56 = vector.shape_cast %55 : vector<4x8xf32> to vector<4x8x1xf32>
    %57 = tpu.reciprocal %56 {approx = true} : vector<4x8x1xf32> -> vector<4x8x1xf32>
    %58 = vector.broadcast %57 : vector<4x8x1xf32> to vector<4x8x8xf32>
    %59 = arith.mulf %54, %58 : vector<4x8x8xf32>
    %60 = arith.truncf %59 : vector<4x8x8xf32> to vector<4x8x8xbf16>
    %cst_21 = arith.constant dense<0.000000e+00> : vector<4x8x32xf32>
    %61 = tpu.matmul %60, %40, %cst_21 {dimension_numbers = #tpu.dot_dimension_numbers<[2], [1], [1], [2], [0, 0, 0, 1, 1, 2], [0], [0]>} : vector<4x8x8xbf16>, vector<4x8x32xbf16>, vector<4x8x32xf32> -> vector<4x8x32xf32>
    %62 = arith.truncf %61 : vector<4x8x32xf32> to vector<4x8x32xbf16>
    %c0_22 = arith.constant 0 : index
    %c0_23 = arith.constant 0 : index
    %c0_24 = arith.constant 0 : index
    %63 = vector.load %arg6[%c0_22, %c0_23, %c0_24] : memref<4x32x128xbf16, #tpu.memory_space<vmem>>, vector<4x32x128xbf16>
    %cst_25 = arith.constant dense<0.000000e+00> : vector<4x8x128xf32>
    %64 = tpu.matmul %62, %63, %cst_25 {dimension_numbers = #tpu.dot_dimension_numbers<[2], [1], [1], [2], [0, 0, 0, 1, 1, 2], [0], [0]>} : vector<4x8x32xbf16>, vector<4x32x128xbf16>, vector<4x8x128xf32> -> vector<4x8x128xf32>
    %cst_26 = arith.constant dense<0.000000e+00> : vector<8x128xf32>
    %65 = vector.multi_reduction <add>, %64, %cst_26 [0] : vector<4x8x128xf32> to vector<8x128xf32>
    %66 = arith.addf %1, %65 : vector<8x128xf32>
    %c0_27 = arith.constant 0 : index
    %c0_28 = arith.constant 0 : index
    %67 = vector.load %arg7[%c0_27, %c0_28] : memref<1x128xf32, #tpu.memory_space<vmem>>, vector<1x128xf32>
    %68 = vector.broadcast %67 : vector<1x128xf32> to vector<8x128xf32>
    %69 = arith.addf %66, %68 : vector<8x128xf32>
    %c0_29 = arith.constant 0 : index
    %c0_30 = arith.constant 0 : index
    %70 = vector.load %arg8[%c0_29, %c0_30] : memref<1x128xf32, #tpu.memory_space<vmem>>, vector<1x128xf32>
    %c0_31 = arith.constant 0 : index
    %c0_32 = arith.constant 0 : index
    %71 = vector.load %arg9[%c0_31, %c0_32] : memref<1x128xf32, #tpu.memory_space<vmem>>, vector<1x128xf32>
    %cst_33 = arith.constant dense<0.000000e+00> : vector<8xf32>
    %72 = vector.multi_reduction <add>, %69, %cst_33 [1] : vector<8x128xf32> to vector<8xf32>
    %73 = vector.shape_cast %72 : vector<8xf32> to vector<8x1xf32>
    %cst_34 = arith.constant 1.280000e+02 : f32
    %74 = vector.broadcast %cst_34 : f32 to vector<8x1xf32>
    %75 = arith.divf %73, %74 : vector<8x1xf32>
    %76 = vector.broadcast %75 : vector<8x1xf32> to vector<8x128xf32>
    %77 = arith.subf %69, %76 : vector<8x128xf32>
    %78 = arith.mulf %77, %77 : vector<8x128xf32>
    %cst_35 = arith.constant dense<0.000000e+00> : vector<8xf32>
    %79 = vector.multi_reduction <add>, %78, %cst_35 [1] : vector<8x128xf32> to vector<8xf32>
    %80 = vector.shape_cast %79 : vector<8xf32> to vector<8x1xf32>
    %cst_36 = arith.constant 1.280000e+02 : f32
    %81 = vector.broadcast %cst_36 : f32 to vector<8x1xf32>
    %82 = arith.divf %80, %81 : vector<8x1xf32>
    %83 = vector.broadcast %75 : vector<8x1xf32> to vector<8x128xf32>
    %84 = arith.subf %69, %83 : vector<8x128xf32>
    %cst_37 = arith.constant 9.99999974E-6 : f32
    %85 = vector.broadcast %cst_37 : f32 to vector<8x1xf32>
    %86 = arith.addf %82, %85 : vector<8x1xf32>
    %87 = math.rsqrt %86 : vector<8x1xf32>
    %88 = vector.broadcast %87 : vector<8x1xf32> to vector<8x128xf32>
    %89 = arith.mulf %84, %88 : vector<8x128xf32>
    %90 = vector.broadcast %70 : vector<1x128xf32> to vector<8x128xf32>
    %91 = arith.mulf %89, %90 : vector<8x128xf32>
    %92 = vector.broadcast %71 : vector<1x128xf32> to vector<8x128xf32>
    %93 = arith.addf %91, %92 : vector<8x128xf32>
    %94 = arith.truncf %93 : vector<8x128xf32> to vector<8x128xbf16>
    %c0_38 = arith.constant 0 : index
    %c0_39 = arith.constant 0 : index
    %95 = vector.load %arg10[%c0_38, %c0_39] : memref<128x512xbf16, #tpu.memory_space<vmem>>, vector<128x512xbf16>
    %cst_40 = arith.constant dense<0.000000e+00> : vector<8x512xf32>
    %96 = tpu.matmul %94, %95, %cst_40 {dimension_numbers = #tpu.dot_dimension_numbers<[1], [0], [0], [1], [0, 0, 1, 1], [], []>} : vector<8x128xbf16>, vector<128x512xbf16>, vector<8x512xf32> -> vector<8x512xf32>
    %c0_41 = arith.constant 0 : index
    %c0_42 = arith.constant 0 : index
    %97 = vector.load %arg11[%c0_41, %c0_42] : memref<1x512xf32, #tpu.memory_space<vmem>>, vector<1x512xf32>
    %98 = vector.broadcast %97 : vector<1x512xf32> to vector<8x512xf32>
    %99 = arith.addf %96, %98 : vector<8x512xf32>
    %100 = arith.mulf %99, %99 : vector<8x512xf32>
    %101 = arith.mulf %99, %100 : vector<8x512xf32>
    %cst_43 = arith.constant 4.471500e-02 : f32
    %102 = vector.broadcast %cst_43 : f32 to vector<8x512xf32>
    %103 = arith.mulf %102, %101 : vector<8x512xf32>
    %104 = arith.addf %99, %103 : vector<8x512xf32>
    %cst_44 = arith.constant 0.797884583 : f32
    %105 = vector.broadcast %cst_44 : f32 to vector<8x512xf32>
    %106 = arith.mulf %105, %104 : vector<8x512xf32>
    %107 = math.tanh %106 : vector<8x512xf32>
    %cst_45 = arith.constant 1.000000e+00 : f32
    %108 = vector.broadcast %cst_45 : f32 to vector<8x512xf32>
    %109 = arith.addf %108, %107 : vector<8x512xf32>
    %cst_46 = arith.constant 5.000000e-01 : f32
    %110 = vector.broadcast %cst_46 : f32 to vector<8x512xf32>
    %111 = arith.mulf %110, %109 : vector<8x512xf32>
    %112 = arith.mulf %99, %111 : vector<8x512xf32>
    %113 = arith.truncf %112 : vector<8x512xf32> to vector<8x512xbf16>
    %c0_47 = arith.constant 0 : index
    %c0_48 = arith.constant 0 : index
    %114 = vector.load %arg12[%c0_47, %c0_48] : memref<512x128xbf16, #tpu.memory_space<vmem>>, vector<512x128xbf16>
    %cst_49 = arith.constant dense<0.000000e+00> : vector<8x128xf32>
    %115 = tpu.matmul %113, %114, %cst_49 {dimension_numbers = #tpu.dot_dimension_numbers<[1], [0], [0], [1], [0, 0, 1, 1], [], []>} : vector<8x512xbf16>, vector<512x128xbf16>, vector<8x128xf32> -> vector<8x128xf32>
    %c0_50 = arith.constant 0 : index
    %c0_51 = arith.constant 0 : index
    %116 = vector.load %arg13[%c0_50, %c0_51] : memref<1x128xf32, #tpu.memory_space<vmem>>, vector<1x128xf32>
    %117 = vector.broadcast %116 : vector<1x128xf32> to vector<8x128xf32>
    %118 = arith.addf %115, %117 : vector<8x128xf32>
    %119 = arith.addf %69, %118 : vector<8x128xf32>
    %c0_52 = arith.constant 0 : index
    %c0_53 = arith.constant 0 : index
    %c0_54 = arith.constant 0 : index
    %120 = vector.load %arg14[%c0_52, %c0_53, %c0_54] : memref<1x8x128xf32, #tpu.memory_space<vmem>>, vector<1x8x128xf32>
    %121 = vector.shape_cast %120 : vector<1x8x128xf32> to vector<8x128xf32>
    %122 = vector.shape_cast %119 : vector<8x128xf32> to vector<1x8x128xf32>
    tpu.vector_store %arg14[%c0_52, %c0_53, %c0_54], %122 {strides = array<i32>} : memref<1x8x128xf32, #tpu.memory_space<vmem>>, vector<1x8x128xf32>,
    return
  }
  func.func @transform_0(%arg0: i32) -> (i32, i32, i32) {
    %c0_i32 = arith.constant 0 : i32
    %c0_i32_0 = arith.constant 0 : i32
    %c0_i32_1 = arith.constant 0 : i32
    return %arg0, %c0_i32, %c0_i32_0 : i32, i32, i32
  }
  func.func @transform_1(%arg0: i32) -> (i32, i32) {
    %c0_i32 = arith.constant 0 : i32
    %c0_i32_0 = arith.constant 0 : i32
    %c0_i32_1 = arith.constant 0 : i32
    return %c0_i32, %c0_i32_0 : i32, i32
  }
  func.func @transform_2(%arg0: i32) -> (i32, i32) {
    %c0_i32 = arith.constant 0 : i32
    %c0_i32_0 = arith.constant 0 : i32
    %c0_i32_1 = arith.constant 0 : i32
    return %c0_i32, %c0_i32_0 : i32, i32
  }
  func.func @transform_3(%arg0: i32) -> (i32, i32, i32) {
    %c0_i32 = arith.constant 0 : i32
    %c0_i32_0 = arith.constant 0 : i32
    %c0_i32_1 = arith.constant 0 : i32
    %c0_i32_2 = arith.constant 0 : i32
    return %c0_i32, %c0_i32_0, %c0_i32_1 : i32, i32, i32
  }
  func.func @transform_4(%arg0: i32) -> (i32, i32, i32) {
    %c0_i32 = arith.constant 0 : i32
    %c0_i32_0 = arith.constant 0 : i32
    %c0_i32_1 = arith.constant 0 : i32
    %c0_i32_2 = arith.constant 0 : i32
    return %c0_i32, %c0_i32_0, %c0_i32_1 : i32, i32, i32
  }
  func.func @transform_5(%arg0: i32) -> (i32, i32, i32) {
    %c0_i32 = arith.constant 0 : i32
    %c0_i32_0 = arith.constant 0 : i32
    %c0_i32_1 = arith.constant 0 : i32
    %c0_i32_2 = arith.constant 0 : i32
    return %c0_i32, %c0_i32_0, %c0_i32_1 : i32, i32, i32
  }
  func.func @transform_6(%arg0: i32) -> (i32, i32) {
    %c0_i32 = arith.constant 0 : i32
    %c0_i32_0 = arith.constant 0 : i32
    %c0_i32_1 = arith.constant 0 : i32
    return %c0_i32, %c0_i32_0 : i32, i32
  }
  func.func @transform_7(%arg0: i32) -> (i32, i32) {
    %c0_i32 = arith.constant 0 : i32
    %c0_i32_0 = arith.constant 0 : i32
    %c0_i32_1 = arith.constant 0 : i32
    return %c0_i32, %c0_i32_0 : i32, i32
  }
  func.func @transform_8(%arg0: i32) -> (i32, i32) {
    %c0_i32 = arith.constant 0 : i32
    %c0_i32_0 = arith.constant 0 : i32
    %c0_i32_1 = arith.constant 0 : i32
    return %c0_i32, %c0_i32_0 : i32, i32
  }
  func.func @transform_9(%arg0: i32) -> (i32, i32) {
    %c0_i32 = arith.constant 0 : i32
    %c0_i32_0 = arith.constant 0 : i32
    %c0_i32_1 = arith.constant 0 : i32
    return %c0_i32, %c0_i32_0 : i32, i32
  }
  func.func @transform_10(%arg0: i32) -> (i32, i32) {
    %c0_i32 = arith.constant 0 : i32
    %c0_i32_0 = arith.constant 0 : i32
    %c0_i32_1 = arith.constant 0 : i32
    return %c0_i32, %c0_i32_0 : i32, i32
  }
  func.func @transform_11(%arg0: i32) -> (i32, i32) {
    %c0_i32 = arith.constant 0 : i32
    %c0_i32_0 = arith.constant 0 : i32
    %c0_i32_1 = arith.constant 0 : i32
    return %c0_i32, %c0_i32_0 : i32, i32
  }
  func.func @transform_12(%arg0: i32) -> (i32, i32) {
    %c0_i32 = arith.constant 0 : i32
    %c0_i32_0 = arith.constant 0 : i32
    %c0_i32_1 = arith.constant 0 : i32
    return %c0_i32, %c0_i32_0 : i32, i32
  }
  func.func @transform_13(%arg0: i32) -> (i32, i32, i32) {
    %c0_i32 = arith.constant 0 : i32
    %c0_i32_0 = arith.constant 0 : i32
    %c0_i32_1 = arith.constant 0 : i32
    return %arg0, %c0_i32, %c0_i32_0 : i32, i32, i32
  }
}

</mosaic_0001>

<bundles_post_ra>
// kernel: sharded_gpt_forward.5
= control target key start
LH: loop header
LB: loop body
LE: loop exit
PB: predicated region body
PF: predicated region fallthrough
CT: control target
= control target key end

     0   :  { %9 = vsyncpa [#allocation3], 0  ;;  %s565_s0 = inlined_call_operand.hbm [shape: f32[16,128], index: 0, kind: input, shape index: {}]   ;;  %s566_s1 = inlined_call_operand.hbm [shape: f32[1,128], index: 1, kind: input, shape index: {}]   ;;  %s567_s2 = inlined_call_operand.hbm [shape: f32[1,128], index: 2, kind: input, shape index: {}]   ;;  %s568_s3 = inlined_call_operand.hbm [shape: bf16[128,256], index: 3, kind: input, shape index: {}]   ;;  %s569_s4 = inlined_call_operand.hbm [shape: f32[16,256], index: 4, kind: output, shape index: {}]  }
   0x1   :  { %10 = vsyncpa [#allocation6], 0 }
   0x2   :  { %11 = vsyncpa [#allocation9], 0 }
   0x3   :  { %12 = vsyncpa [#allocation4], 0  ;;  %s450_s15 = smov [#allocation5]   ;;  %s451_s17 = smov [#allocation2]  }
   0x4   :  { %s31_s16 = sshll.u32 %s450_s15, 4  ;;  %s18_s18 = sshll.u32 %s451_s17, 4  ;;  %s32_s16 = int_to_ptr.vmem [resolvable:$true] %s31_s16  ;;  %s485_s18 = int_to_ptr.vmem [resolvable:$true] %s18_s18 }
   0x5   :  { %s332_s21 = scalar_lea.hbm %s566_s1, 16 }
   0x6   :  { %p333_p0 = scmp.ne.s32.totalorder %s566_s1, %s332_s21  ;;  %p336_p1 = scmp.lt.u32.totalorder %s332_s21, %s566_s1 }
   0x8   :  { %p338_p2 = pnand %p336_p1, %p333_p0 }
   0xa   :  { %341 = shalt.err (!%p338_p2)
}
   0xb   :  { %s342_s26 = scalar_lea.vmem %s32_s16, 16  ;;  %s346_s27 = scalar_lea.vmem %s32_s16, 32 }
   0xc   :  { %p343_p3 = scmp.ne.s32.totalorder %s32_s16, %s342_s26  ;;  %p347_p4 = scmp.lt.s32.totalorder %s32_s16, %s32_s16 }
   0xd   :  { %p348_p5 = scmp.lt.s32.totalorder %s346_s27, %s342_s26 }
   0xf   :  { %p349_p6 = por %p348_p5, %p347_p4 }
  0x11   :  { %p350_p7 = pnand %p349_p6, %p343_p3 }
  0x13   :  { %353 = shalt.err (!%p350_p7)
}
  0x14   :  { %34 = dma.hbm_to_vmem [thread:$0]  %s566_s1, 16, %s32_s16, [#allocation6]  }
  0x15   :  { %s354_s6 = scalar_lea.hbm %s565_s0, 256 }
  0x16   :  { %p355_p8 = scmp.ne.s32.totalorder %s565_s0, %s354_s6  ;;  %p358_p9 = scmp.lt.u32.totalorder %s354_s6, %s565_s0 }
  0x18   :  { %p360_p10 = pnand %p358_p9, %p355_p8 }
  0x1a   :  { %363 = shalt.err (!%p360_p10)
}
  0x1b   :  { %s364_s11 = scalar_lea.vmem %s485_s18, 256  ;;  %p369_p12 = scmp.lt.s32.totalorder %s485_s18, %s485_s18 }
  0x1c   :  { %p365_p11 = scmp.ne.s32.totalorder %s485_s18, %s364_s11  ;;  %p370_p13 = scmp.lt.s32.totalorder %s364_s11, %s364_s11 }
  0x1e   :  { %p371_p0 = por %p370_p13, %p369_p12 }
  0x20   :  { %p372_p1 = pnand %p371_p0, %p365_p11 }
  0x22   :  { %375 = shalt.err (!%p372_p1)
}
  0x23   :  { %s452_s1 = smov 128   ;;  %s453_s12 = smov 8  }
  0x24   :  { %24 = dma.hbm_to_vmem [thread:$0]  %s565_s0, 256, %s485_s18, [#allocation3], %s452_s1, %s452_s1, %s453_s12  }
  0x25   :  { %s454_s15 = smov [#allocation7]   ;;  %s455_s17 = smov [#allocation8]  }
  0x26   :  { %s41_s16 = sshll.u32 %s454_s15, 4  ;;  %s50_s19 = sshll.u32 %s455_s17, 4  ;;  %s42_s16 = int_to_ptr.vmem [resolvable:$true] %s41_s16  ;;  %s519_s19 = int_to_ptr.vmem [resolvable:$true] %s50_s19 }
  0x27   :  { %s376_s22 = scalar_lea.hbm %s567_s2, 16 }
  0x28   :  { %p377_p2 = scmp.ne.s32.totalorder %s567_s2, %s376_s22  ;;  %p380_p3 = scmp.lt.u32.totalorder %s376_s22, %s567_s2 }
  0x2a   :  { %p382_p4 = pnand %p380_p3, %p377_p2 }
  0x2c   :  { %385 = shalt.err (!%p382_p4)
}
  0x2d   :  { %s386_s0 = scalar_lea.vmem %s42_s16, 16  ;;  %s390_s18 = scalar_lea.vmem %s42_s16, 32 }
  0x2e   :  { %p387_p5 = scmp.ne.s32.totalorder %s42_s16, %s386_s0  ;;  %p391_p6 = scmp.lt.s32.totalorder %s42_s16, %s42_s16 }
  0x2f   :  { %p392_p7 = scmp.lt.s32.totalorder %s390_s18, %s386_s0 }
  0x31   :  { %p393_p8 = por %p392_p7, %p391_p6 }
  0x33   :  { %p394_p9 = pnand %p393_p8, %p387_p5 }
  0x35   :  { %397 = shalt.err (!%p394_p9)
}
  0x36   :  { %44 = dma.hbm_to_vmem [thread:$0]  %s567_s2, 16, %s42_s16, [#allocation6]  }
  0x37   :  { %s398_s5 = scalar_lea.hbm %s568_s3, 2048 }
  0x38   :  { %p399_p10 = scmp.ne.s32.totalorder %s568_s3, %s398_s5  ;;  %p402_p11 = scmp.lt.u32.totalorder %s398_s5, %s568_s3 }
  0x3a   :  { %p404_p12 = pnand %p402_p11, %p399_p10 }
  0x3c   :  { %407 = shalt.err (!%p404_p12)
}
  0x3d   :  { %s408_s10 = scalar_lea.vmem %s519_s19, 2048  ;;  %p413_p0 = scmp.lt.s32.totalorder %s519_s19, %s519_s19 }
  0x3e   :  { %p409_p13 = scmp.ne.s32.totalorder %s519_s19, %s408_s10  ;;  %p414_p1 = scmp.lt.s32.totalorder %s408_s10, %s408_s10 }
  0x40   :  { %p415_p2 = por %p414_p1, %p413_p0 }
  0x42   :  { %p416_p3 = pnand %p415_p2, %p409_p13 }
  0x44   :  { %419 = shalt.err (!%p416_p3)
}
  0x45   :  { %56 = dma.hbm_to_vmem [thread:$0]  %s568_s3, 2048, %s519_s19, [#allocation9], %s452_s1, %s452_s1, %s453_s12  }
  0x46   :  { %442 = dma.done.wait [#allocation3], 256  }
  0x47   :  { %443 = vsyncadd [#allocation3], 4294967040 }
  0x48   :  { %444 = dma.done.wait [#allocation6], 32  }
  0x49   :  { %445 = vsyncadd [#allocation6], 4294967264 }
  0x4a   :  { %446 = dma.done.wait [#allocation9], 2048  }
  0x4b   :  { %447 = vsyncadd [#allocation9], 4294965248  ;;  %v70_v0 = vld [vmem:[#allocation2] sm:$0xff]  ;;  %v71_v1 = vld [vmem:[#allocation2 + $0x8] sm:$0xff]  ;;  %v456_v21 = vmov 0   ;;  %s457_s3 = smov [#allocation10]  }
  0x4c   :  { %74 = vadd.xlane.f32.xlu0 %v70_v0  ;;  %v304_v2 = vld [vmem:[#allocation8 + $0x4] ss:$8 sps:$4 sm:$0xff]   ;;  %v306_v3 = vld [vmem:[#allocation8] ss:$8 sps:$4 sm:$0xff]   ;;  %v307_v4 = vld [vmem:[#allocation8 + $0x14] ss:$8 sps:$4 sm:$0xff]   ;;  %242 = vmatprep.mubr.bf16.mxu0 %v456_v21 }
  0x4d   :  { %210 = vmatprep.subr.bf16.mxu0 %v304_v2  ;;  %v309_v13 = vld [vmem:[#allocation8 + $0x10] ss:$8 sps:$4 sm:$0xff]   ;;  %v310_v14 = vld [vmem:[#allocation8 + $0x24] ss:$8 sps:$4 sm:$0xff]   ;;  %v312_v15 = vld [vmem:[#allocation8 + $0x20] ss:$8 sps:$4 sm:$0xff]  }
  0x4e   :  { %211 = vmatpush1.bf16.msra.mxu0 %v306_v3  ;;  %v313_v16 = vld [vmem:[#allocation8 + $0x34] ss:$8 sps:$4 sm:$0xff]   ;;  %v315_v17 = vld [vmem:[#allocation8 + $0x30] ss:$8 sps:$4 sm:$0xff]   ;;  %v316_v18 = vld [vmem:[#allocation8 + $0x44] ss:$8 sps:$4 sm:$0xff]  }
  0x4f   :  { %212 = vmatprep.subr.bf16.mxu0 %v307_v4  ;;  %v318_v19 = vld [vmem:[#allocation8 + $0x40] ss:$8 sps:$4 sm:$0xff]   ;;  %v319_v20 = vld [vmem:[#allocation8 + $0x54] ss:$8 sps:$4 sm:$0xff]   ;;  %v321_v22 = vld [vmem:[#allocation8 + $0x50] ss:$8 sps:$4 sm:$0xff]  }
  0x50   :  { %76 = vadd.xlane.f32.xlu0 %v71_v1  ;;  %v322_v23 = vld [vmem:[#allocation8 + $0x64] ss:$8 sps:$4 sm:$0xff]   ;;  %v324_v24 = vld [vmem:[#allocation8 + $0x60] ss:$8 sps:$4 sm:$0xff]   ;;  %v325_v25 = vld [vmem:[#allocation8 + $0x74] ss:$8 sps:$4 sm:$0xff]  }
  0x51   :  { %v327_v26 = vld [vmem:[#allocation8 + $0x70] ss:$8 sps:$4 sm:$0xff]   ;;  %v276_v35 = vld [vmem:[#allocation5] ss:$0 sm:$0xff]  ;;  %v277_v39 = vld [vmem:[#allocation7] ss:$0 sm:$0xff] }
  0x52   :  { %213 = vmatpush1.bf16.msra.mxu0 %v309_v13  ;;  %s262_s1 = sshll.u32 %s457_s3, 4  ;;  %s263_s1 = int_to_ptr.vmem [resolvable:$true] %s262_s1 }
  0x53   :  { %214 = vmatprep.subr.bf16.mxu0 %v310_v14  ;;  %s420_s12 = scalar_lea.vmem %s263_s1, 512  ;;  %p425_p5 = scmp.lt.s32.totalorder %s263_s1, %s263_s1 }
  0x54   :  { %p421_p4 = scmp.ne.s32.totalorder %s263_s1, %s420_s12  ;;  %p426_p6 = scmp.lt.s32.totalorder %s420_s12, %s420_s12 }
  0x56   :  { %215 = vmatpush1.bf16.msra.mxu0 %v312_v15  ;;  %p427_p7 = por %p426_p6, %p425_p5 }
  0x57   :  { %216 = vmatprep.subr.bf16.mxu0 %v313_v16 }
  0x58   :  { %p428_p8 = pnand %p427_p7, %p421_p4 }
  0x5a   :  { %217 = vmatpush1.bf16.msra.mxu0 %v315_v17 }
  0x5b   :  { %218 = vmatprep.subr.bf16.mxu0 %v316_v18 }
  0x5e   :  { %219 = vmatpush1.bf16.msra.mxu0 %v318_v19 }
  0x5f   :  { %220 = vmatprep.subr.bf16.mxu0 %v319_v20 }
  0x62   :  { %221 = vmatpush1.bf16.msra.mxu0 %v321_v22 }
  0x63   :  { %222 = vmatprep.subr.bf16.mxu0 %v322_v23 }
  0x66   :  { %223 = vmatpush1.bf16.msra.mxu0 %v324_v24 }
  0x67   :  { %224 = vmatprep.subr.bf16.mxu0 %v325_v25 }
  0x6a   :  { %225 = vmatpush1.bf16.msra.mxu0 %v327_v26 }
  0xd9   :  { %v75_v5 = vpop.xlane.xlu0 %74 }
  0xda   :  { %v79_v6 = vmul.f32 0.0078125, %v75_v5 }
  0xdc   :  { %v81_v7 = vsub.f32 %v70_v0, %v79_v6 }
  0xdd   :  { %v77_v8 = vpop.xlane.xlu0 %76 }
  0xde   :  { %v80_v9 = vmul.f32 0.0078125, %v77_v8  ;;  %v83_v10 = vmul.f32 %v81_v7, %v81_v7 }
  0xe0   :  { %v82_v11 = vsub.f32 %v71_v1, %v80_v9  ;;  %85 = vadd.xlane.f32.xlu1 %v83_v10 }
  0xe2   :  { %v84_v12 = vmul.f32 %v82_v11, %v82_v11 }
  0xe4   :  { %87 = vadd.xlane.f32.xlu1 %v84_v12 }
 0x16d   :  { %v86_v27 = vpop.xlane.xlu1 %85 }
 0x16e   :  { %v89_v28 = vmul.f32 0.0078125, %v86_v27 }
 0x170   :  { %v91_v29 = vadd.f32 1e-05, %v89_v28 }
 0x171   :  { %v88_v30 = vpop.xlane.xlu1 %87 }
 0x172   :  { %328 = vrsqrt.f32 %v91_v29  ;;  %v90_v31 = vmul.f32 0.0078125, %v88_v30 }
 0x174   :  { %v92_v32 = vadd.f32 1e-05, %v90_v31 }
 0x176   :  { %330 = vrsqrt.f32 %v92_v32 }
 0x17c   :  { %v329_v33 = vpop.eup %328 }
 0x17d   :  { %v95_v34 = vmul.f32 %v329_v33, %v81_v7 }
 0x17f   :  { %v103_v38 = vmul.f32 %v276_v35, %v95_v34 }
 0x180   :  { %v331_v36 = vpop.eup %330 }
 0x181   :  { %v96_v37 = vmul.f32 %v331_v36, %v82_v11  ;;  %v111_v41 = vadd.f32 %v277_v39, %v103_v38 }
 0x183   :  { %v104_v40 = vmul.f32 %v276_v35, %v96_v37 }
 0x185   :  { %v112_v42 = vadd.f32 %v277_v39, %v104_v40 }
 0x187   :  { %v113_v43 = vpack.c.bf16 %v112_v42, %v111_v41 }
 0x189   :  { %243 = vmatmul.mubr.bf16.vlgmr.msra.gmra.mrb[0].mxu0 %v113_v43 }
 0x25c   :  { %v244_v44 = vpop.f32.mrb[0].mxu0 }
 0x25d   :  { %253 = vst [vmem:[#allocation10] sm:$0xff] %v244_v44  ;;  %v246_v45 = vpop.f32.mrb[1].mxu0 }
 0x25e   :  { %254 = vst [vmem:[#allocation10 + $0x8] sm:$0xff] %v246_v45  ;;  %v248_v46 = vpop.f32.mrb[2].mxu0 }
 0x25f   :  { %255 = vst [vmem:[#allocation10 + $0x10] sm:$0xff] %v248_v46  ;;  %v250_v47 = vpop.f32.mrb[3].mxu0 }
 0x260   :  { %256 = vst [vmem:[#allocation10 + $0x18] sm:$0xff] %v250_v47 }
 0x261   :  { %431 = shalt.err (!%p428_p8)
}
 0x262   :  { %s432_s15 = scalar_lea.hbm %s569_s4, 512 }
 0x263   :  { %p433_p9 = scmp.ne.s32.totalorder %s569_s4, %s432_s15  ;;  %p436_p10 = scmp.lt.u32.totalorder %s432_s15, %s569_s4 }
 0x265   :  { %p438_p11 = pnand %p436_p10, %p433_p9 }
 0x267   :  { %441 = shalt.err (!%p438_p11)
}
 0x268   :  { %s458_s21 = smov 256   ;;  %s459_s22 = smov 16  }
 0x269   :  { %268 = dma.vmem_to_hbm [thread:$0]  %s263_s1, 512, %s569_s4, [#allocation4], %s458_s21, %s458_s21, %s459_s22  }
 0x26a   :  { %448 = dma.done.wait [#allocation4], 512  }
 0x26b   :  { %449 = vsyncadd [#allocation4], 4294966784 }
 0x26c   :  { %272 = vsyncpa [#allocation3], 1 }
 0x26d   :  { %273 = vsyncpa [#allocation6], 1 }
 0x26e   :  { %274 = vsyncpa [#allocation9], 1 }
 0x26f   :  { %275 = vsyncpa [#allocation4], 1 }

// kernel: sharded_gpt_forward.3
= control target key start
LH: loop header
LB: loop body
LE: loop exit
PB: predicated region body
PF: predicated region fallthrough
CT: control target
= control target key end

     0   :  { %s4619_s0 = inlined_call_operand.hbm [shape: f32[2,8,128], index: 0, kind: input, shape index: {}]   ;;  %s4620_s1 = inlined_call_operand.hbm [shape: f32[1,128], index: 1, kind: input, shape index: {}]   ;;  %s4621_s2 = inlined_call_operand.hbm [shape: f32[1,128], index: 2, kind: input, shape index: {}]   ;;  %s4622_s3 = inlined_call_operand.hbm [shape: bf16[4,128,96], index: 3, kind: input, shape index: {}]   ;;  %s4623_s4 = inlined_call_operand.hbm [shape: f32[4,1,96], index: 4, kind: input, shape index: {}]   ;;  %s4624_s5 = inlined_call_operand.hbm [shape: bf16[4,32,128], index: 5, kind: input, shape index: {}]   ;;  %s4625_s6 = inlined_call_operand.hbm [shape: f32[1,128], index: 6, kind: input, shape index: {}]   ;;  %s4626_s7 = inlined_call_operand.hbm [shape: f32[1,128], index: 7, kind: input, shape index: {}]   ;;  %s4627_s8 = inlined_call_operand.hbm [shape: f32[1,128], index: 8, kind: input, shape index: {}]   ;;  %s4628_s9 = inlined_call_operand.hbm [shape: bf16[128,512], index: 9, kind: input, shape index: {}]   ;;  %s4629_s10 = inlined_call_operand.hbm [shape: f32[1,512], index: 10, kind: input, shape index: {}]   ;;  %s4630_s11 = inlined_call_operand.hbm [shape: bf16[512,128], index: 11, kind: input, shape index: {}]   ;;  %s4631_s12 = inlined_call_operand.hbm [shape: f32[1,128], index: 12, kind: input, shape index: {}]   ;;  %s4632_s13 = inlined_call_operand.hbm [shape: f32[2,8,128], index: 13, kind: output, shape index: {}]  }
   0x1   :  { %4641 = sst [smem:[#allocation33_spill]] %s4619_s0 }
   0x2   :  { %4642 = sst [smem:[#allocation34_spill]] %s4620_s1 }
   0x3   :  { %4643 = sst [smem:[#allocation35_spill]] %s4622_s3 }
   0x4   :  { %4644 = sst [smem:[#allocation36_spill]] %s4624_s5 }
   0x5   :  { %4645 = sst [smem:[#allocation37_spill]] %s4626_s7 }
   0x6   :  { %4646 = sst [smem:[#allocation38_spill]] %s4632_s13 }
   0x7   :  { %18 = vsyncpa [#allocation3], 0 }
   0x8   :  { %20 = vsyncpa [#allocation3 + $0x1], 0 }
   0x9   :  { %21 = vsyncpa [#allocation6], 0 }
   0xa   :  { %22 = vsyncpa [#allocation9], 0 }
   0xb   :  { %23 = vsyncpa [#allocation12], 0 }
   0xc   :  { %24 = vsyncpa [#allocation15], 0 }
   0xd   :  { %25 = vsyncpa [#allocation18], 0 }
   0xe   :  { %26 = vsyncpa [#allocation21], 0 }
   0xf   :  { %27 = vsyncpa [#allocation4], 0 }
  0x10   :  { %29 = vsyncpa [#allocation4 + $0x1], 0  ;;  %s4012_s25 = smov 0   ;;  %s4014_s26 = smov 0  }
  0x11   :  { %s4016_s27 = smov 0   ;;  %s4018_s28 = smov 0  }
  0x12 LB: > { %s3918_s29 = smov [#allocation5]   ;;  %s4033_s14 = sadd.s32 4294967295, %s3916_s28   ;;  %s3916_s28 = sphi %s4018_s28, %s4684_s28   ;;  %s3912_s27 = sphi %s4016_s27, %s4683_s27   ;;  %s3908_s26 = sphi %s4014_s26, %s4682_s26   ;;  %s3904_s25 = sphi %s4012_s25, %s4681_s25  }
  0x13   : > { %s357_s30 = sshll.u32 %s3918_s29, 4  ;;  %p2705_p0 = scmp.ge.s32.totalorder %s3916_s28, 1  ;;  %s4038_s30 = int_to_ptr.vmem [resolvable:$true] %s357_s30 }
  0x14   : > { %p4636_p1 = scmp.eq.s32.totalorder %s4033_s14, 0  ;;  %p344_p2 = scmp.lt.s32.totalorder %s3916_s28, 3 }
  0x15   : > { %s3919_s16 = smov [#allocation8]   ;;  %s3920_s19 = smov [#allocation11]  }
  0x16   : > { %p4040_p3 = pnand %p2705_p0, %p344_p2  ;;  %s378_s17 = sshll.u32 %s3919_s16, 4  ;;  %s4047_s17 = int_to_ptr.vmem [resolvable:$true] %s378_s17 }
  0x17   : > { %s404_s20 = sshll.u32 %s3920_s19, 4  ;;  %s4650_s1 = sld [smem:[#allocation34_spill]]  ;;  %s4055_s20 = int_to_ptr.vmem [resolvable:$true] %s404_s20 }
  0x18   : > { %s4647_s15 = scalar_select %p4040_p3, 1, 0 }
  0x19   : > { %p3186_p5 = pneg %p4040_p3 }
  0x1a   : > { %4648 = sst [smem:[#allocation32_spill]] %s4647_s15 }
  0x1b   : > { %p4051_p6 = pnand %p3186_p5, %p4636_p1 }
  0x1d   : > { %s3460_s23 = scalar_lea.hbm %s4650_s1, 16  ;;  %p4065_p8 = pneg %p4051_p6 }
  0x1e   : > { %p3461_p7 = scmp.ne.s32.totalorder %s4650_s1, %s3460_s23  ;;  %p3467_p11 = scmp.lt.u32.totalorder %s3460_s23, %s4650_s1 }
  0x20   : > { %p3463_p9 = pnand %p4065_p8, %p3461_p7 }
  0x22   : > { %p3464_p10 = pneg %p3463_p9 }
  0x24   : > { %p3469_p12 = pnand %p3467_p11, %p3464_p10 }
  0x26   : > { %3472 = shalt.err (!%p3469_p12)
}
  0x27   : > { %s3473_s21 = scalar_lea.vmem %s4038_s30, 16  ;;  %s3480_s22 = scalar_lea.vmem %s4038_s30, 32 }
  0x28   : > { %p3474_p13 = scmp.ne.s32.totalorder %s4038_s30, %s3473_s21  ;;  %p3481_p5 = scmp.lt.s32.totalorder %s4038_s30, %s4038_s30 }
  0x29   : > { %p3482_p7 = scmp.lt.s32.totalorder %s3480_s22, %s3473_s21 }
  0x2a   : > { %p3476_p0 = pnand %p3474_p13, %p4065_p8 }
  0x2b   : > { %p3483_p9 = por %p3482_p7, %p3481_p5 }
  0x2c   : > { %p3477_p2 = pneg %p3476_p0 }
  0x2e   : > { %p3484_p4 = pnand %p3483_p9, %p3477_p2 }
  0x30   : > { %3487 = shalt.err (!%p3484_p4)
}
  0x31   : > { %3189 = dma.hbm_to_vmem [thread:$0]  (!%p4051_p6), %s4650_s1, 16, %s4038_s30, [#allocation6]  }
  0x32   : > { %s4652_s3 = sld [smem:[#allocation35_spill]] }
  0x38   : > { %s3488_s19 = scalar_lea.hbm %s4652_s3, 4096 }
  0x39   : > { %p3489_p10 = scmp.ne.s32.totalorder %s4652_s3, %s3488_s19  ;;  %p3495_p4 = scmp.lt.u32.totalorder %s3488_s19, %s4652_s3 }
  0x3b   : > { %p3491_p11 = pnand %p3489_p10, %p4065_p8 }
  0x3d   : > { %p3492_p12 = pneg %p3491_p11 }
  0x3f   : > { %p3497_p13 = pnand %p3495_p4, %p3492_p12 }
  0x41   : > { %3500 = shalt.err (!%p3497_p13)
}
  0x42   : > { %s3501_s30 = scalar_lea.vmem %s4047_s17, 4096  ;;  %p3509_p7 = scmp.lt.s32.totalorder %s4047_s17, %s4047_s17 }
  0x43   : > { %p3502_p0 = scmp.ne.s32.totalorder %s4047_s17, %s3501_s30  ;;  %p3510_p9 = scmp.lt.s32.totalorder %s3501_s30, %s3501_s30 }
  0x45   : > { %p3504_p2 = pnand %p3502_p0, %p4065_p8  ;;  %p3511_p10 = por %p3510_p9, %p3509_p7 }
  0x47   : > { %p3505_p5 = pneg %p3504_p2 }
  0x49   : > { %p3512_p11 = pnand %p3511_p10, %p3505_p5 }
  0x4b   : > { %3515 = shalt.err (!%p3512_p11)
}
  0x4c   : > { %s4638_s0 = smov 64   ;;  %s4639_s15 = smov 4  }
  0x4d   : > { %3195 = dma.hbm_to_vmem [thread:$0]  (!%p4051_p6), %s4652_s3, 4096, %s4047_s17, [#allocation9], %s4638_s0, %s4638_s0, %s4639_s15  }
  0x4e   : > { %s4653_s5 = sld [smem:[#allocation36_spill]] }
  0x54   : > { %s3516_s19 = scalar_lea.hbm %s4653_s5, 1024 }
  0x55   : > { %p3517_p12 = scmp.ne.s32.totalorder %s4653_s5, %s3516_s19  ;;  %p3523_p0 = scmp.lt.u32.totalorder %s3516_s19, %s4653_s5 }
  0x57   : > { %p3519_p4 = pnand %p3517_p12, %p4065_p8 }
  0x59   : > { %p3520_p13 = pneg %p3519_p4 }
  0x5b   : > { %p3525_p2 = pnand %p3523_p0, %p3520_p13 }
  0x5d   : > { %3528 = shalt.err (!%p3525_p2)
}
  0x5e   : > { %s3529_s17 = scalar_lea.vmem %s4055_s20, 1024  ;;  %p3537_p10 = scmp.lt.s32.totalorder %s4055_s20, %s4055_s20 }
  0x5f   : > { %p3530_p5 = scmp.ne.s32.totalorder %s4055_s20, %s3529_s17  ;;  %p3538_p11 = scmp.lt.s32.totalorder %s3529_s17, %s3529_s17 }
  0x61   : > { %p3532_p7 = pnand %p3530_p5, %p4065_p8  ;;  %p3539_p12 = por %p3538_p11, %p3537_p10 }
  0x63   : > { %p3533_p9 = pneg %p3532_p7 }
  0x65   : > { %p3540_p4 = pnand %p3539_p12, %p3533_p9 }
  0x67   : > { %3543 = shalt.err (!%p3540_p4)
}
  0x68   : > { %3201 = dma.hbm_to_vmem [thread:$0]  (!%p4051_p6), %s4653_s5, 1024, %s4055_s20, [#allocation12], %s4638_s0, %s4638_s0, %s4639_s15  }
  0x69   : > { %s3923_s23 = smov [#allocation14]   ;;  %s4654_s7 = sld [smem:[#allocation37_spill]] }
  0x6a   : > { %s429_s24 = sshll.u32 %s3923_s23, 4  ;;  %s430_s24 = int_to_ptr.vmem [resolvable:$true] %s429_s24 }
  0x6f   : > { %s3544_s21 = scalar_lea.hbm %s4654_s7, 16 }
  0x70   : > { %p3545_p13 = scmp.ne.s32.totalorder %s4654_s7, %s3544_s21  ;;  %p3551_p5 = scmp.lt.u32.totalorder %s3544_s21, %s4654_s7 }
  0x72   : > { %p3547_p0 = pnand %p3545_p13, %p4065_p8 }
  0x74   : > { %p3548_p2 = pneg %p3547_p0 }
  0x76   : > { %p3553_p7 = pnand %p3551_p5, %p3548_p2 }
  0x78   : > { %3556 = shalt.err (!%p3553_p7)
}
  0x79   : > { %s3557_s20 = scalar_lea.vmem %s430_s24, 16  ;;  %s3564_s1 = scalar_lea.vmem %s430_s24, 32 }
  0x7a   : > { %p3558_p9 = scmp.ne.s32.totalorder %s430_s24, %s3557_s20  ;;  %p3565_p12 = scmp.lt.s32.totalorder %s430_s24, %s430_s24 }
  0x7b   : > { %p3566_p4 = scmp.lt.s32.totalorder %s3564_s1, %s3557_s20 }
  0x7c   : > { %p3560_p10 = pnand %p3558_p9, %p4065_p8 }
  0x7d   : > { %p3567_p1 = por %p3566_p4, %p3565_p12 }
  0x7e   : > { %p3561_p11 = pneg %p3560_p10 }
  0x80   : > { %p3568_p3 = pnand %p3567_p1, %p3561_p11 }
  0x82   : > { %3571 = shalt.err (!%p3568_p3)
}
  0x83   : > { %3207 = dma.hbm_to_vmem [thread:$0]  (!%p4051_p6), %s4654_s7, 16, %s430_s24, [#allocation15]  }
  0x84   : > { %s3924_s3 = smov [#allocation17]   ;;  %s3572_s22 = scalar_lea.hbm %s4628_s9, 4096 }
  0x85   : > { %s450_s29 = sshll.u32 %s3924_s3, 4  ;;  %p3573_p13 = scmp.ne.s32.totalorder %s4628_s9, %s3572_s22  ;;  %s451_s29 = int_to_ptr.vmem [resolvable:$true] %s450_s29 }
  0x86   : > { %p3579_p0 = scmp.lt.u32.totalorder %s3572_s22, %s4628_s9 }
  0x87   : > { %p3575_p1 = pnand %p3573_p13, %p4065_p8 }
  0x89   : > { %p3576_p3 = pneg %p3575_p1 }
  0x8b   : > { %p3581_p2 = pnand %p3579_p0, %p3576_p3 }
  0x8d   : > { %3584 = shalt.err (!%p3581_p2)
}
  0x8e   : > { %s3585_s24 = scalar_lea.vmem %s451_s29, 4096  ;;  %p3593_p10 = scmp.lt.s32.totalorder %s451_s29, %s451_s29 }
  0x8f   : > { %p3586_p5 = scmp.ne.s32.totalorder %s451_s29, %s3585_s24  ;;  %p3594_p11 = scmp.lt.s32.totalorder %s3585_s24, %s3585_s24 }
  0x91   : > { %p3588_p7 = pnand %p3586_p5, %p4065_p8  ;;  %p3595_p12 = por %p3594_p11, %p3593_p10 }
  0x93   : > { %p3589_p9 = pneg %p3588_p7 }
  0x95   : > { %p3596_p4 = pnand %p3595_p12, %p3589_p9 }
  0x97   : > { %3599 = shalt.err (!%p3596_p4)
}
  0x98   : > { %s3925_s13 = smov 256   ;;  %s3926_s23 = smov 16  }
  0x99   : > { %3213 = dma.hbm_to_vmem [thread:$0]  (!%p4051_p6), %s4628_s9, 4096, %s451_s29, [#allocation18], %s3925_s13, %s3925_s13, %s3926_s23  }
  0x9a   : > { %s3927_s21 = smov [#allocation20]   ;;  %s3928_s30 = smov [#allocation7]  }
  0x9b   : > { %s474_s22 = sshll.u32 %s3927_s21, 4  ;;  %s368_s17 = sshll.u32 %s3928_s30, 4  ;;  %s475_s22 = int_to_ptr.vmem [resolvable:$true] %s474_s22  ;;  %s369_s17 = int_to_ptr.vmem [resolvable:$true] %s368_s17 }
  0x9c   : > { %s3600_s24 = scalar_lea.hbm %s4630_s11, 4096 }
  0x9d   : > { %p3601_p13 = scmp.ne.s32.totalorder %s4630_s11, %s3600_s24  ;;  %p3607_p0 = scmp.lt.u32.totalorder %s3600_s24, %s4630_s11 }
  0x9f   : > { %p3603_p1 = pnand %p3601_p13, %p4065_p8 }
  0xa1   : > { %p3604_p3 = pneg %p3603_p1 }
  0xa3   : > { %p3609_p2 = pnand %p3607_p0, %p3604_p3 }
  0xa5   : > { %3612 = shalt.err (!%p3609_p2)
}
  0xa6   : > { %s3613_s29 = scalar_lea.vmem %s475_s22, 4096  ;;  %p3621_p10 = scmp.lt.s32.totalorder %s475_s22, %s475_s22 }
  0xa7   : > { %p3614_p5 = scmp.ne.s32.totalorder %s475_s22, %s3613_s29  ;;  %p3622_p11 = scmp.lt.s32.totalorder %s3613_s29, %s3613_s29 }
  0xa9   : > { %p3616_p7 = pnand %p3614_p5, %p4065_p8  ;;  %p3623_p12 = por %p3622_p11, %p3621_p10 }
  0xab   : > { %p3617_p9 = pneg %p3616_p7 }
  0xad   : > { %p3624_p4 = pnand %p3623_p12, %p3617_p9 }
  0xaf   : > { %3627 = shalt.err (!%p3624_p4)
}
  0xb0   : > { %s4655_s0 = smov 4   ;;  %s4656_s15 = smov 64  }
  0xb1   : > { %3219 = dma.hbm_to_vmem [thread:$0]  (!%p4051_p6), %s4630_s11, 4096, %s475_s22, [#allocation21], %s4656_s15, %s4656_s15, %s4655_s0  }
  0xb2   : > { %s3628_s19 = scalar_lea.hbm %s4621_s2, 16 }
  0xb3   : > { %p3629_p13 = scmp.ne.s32.totalorder %s4621_s2, %s3628_s19  ;;  %p3635_p0 = scmp.lt.u32.totalorder %s3628_s19, %s4621_s2 }
  0xb5   : > { %p3631_p1 = pnand %p3629_p13, %p4065_p8 }
  0xb7   : > { %p3632_p3 = pneg %p3631_p1 }
  0xb9   : > { %p3637_p2 = pnand %p3635_p0, %p3632_p3 }
  0xbb   : > { %3640 = shalt.err (!%p3637_p2)
}
  0xbc   : > { %s3641_s24 = scalar_lea.vmem %s369_s17, 16  ;;  %s3648_s22 = scalar_lea.vmem %s369_s17, 32 }
  0xbd   : > { %p3642_p5 = scmp.ne.s32.totalorder %s369_s17, %s3641_s24  ;;  %p3649_p10 = scmp.lt.s32.totalorder %s369_s17, %s369_s17 }
  0xbe   : > { %p3650_p11 = scmp.lt.s32.totalorder %s3648_s22, %s3641_s24 }
  0xbf   : > { %p3644_p7 = pnand %p3642_p5, %p4065_p8 }
  0xc0   : > { %p3651_p12 = por %p3650_p11, %p3649_p10 }
  0xc1   : > { %p3645_p9 = pneg %p3644_p7 }
  0xc3   : > { %p3652_p4 = pnand %p3651_p12, %p3645_p9 }
  0xc5   : > { %3655 = shalt.err (!%p3652_p4)
}
  0xc6   : > { %3192 = dma.hbm_to_vmem [thread:$0]  (!%p4051_p6), %s4621_s2, 16, %s369_s17, [#allocation6]  }
  0xc7   : > { %s3929_s15 = smov [#allocation10]   ;;  %s3656_s3 = scalar_lea.hbm %s4623_s4, 64 }
  0xc8   : > { %s391_s5 = sshll.u32 %s3929_s15, 4  ;;  %p3657_p13 = scmp.ne.s32.totalorder %s4623_s4, %s3656_s3  ;;  %s392_s5 = int_to_ptr.vmem [resolvable:$true] %s391_s5 }
  0xc9   : > { %p3663_p0 = scmp.lt.u32.totalorder %s3656_s3, %s4623_s4 }
  0xca   : > { %p3659_p1 = pnand %p3657_p13, %p4065_p8 }
  0xcc   : > { %p3660_p3 = pneg %p3659_p1 }
  0xce   : > { %p3665_p2 = pnand %p3663_p0, %p3660_p3 }
  0xd0   : > { %3668 = shalt.err (!%p3665_p2)
}
  0xd1   : > { %s3669_s17 = scalar_lea.vmem %s392_s5, 64  ;;  %p3677_p10 = scmp.lt.s32.totalorder %s392_s5, %s392_s5 }
  0xd2   : > { %p3670_p5 = scmp.ne.s32.totalorder %s392_s5, %s3669_s17  ;;  %p3678_p11 = scmp.lt.s32.totalorder %s3669_s17, %s3669_s17 }
  0xd4   : > { %p3672_p7 = pnand %p3670_p5, %p4065_p8  ;;  %p3679_p12 = por %p3678_p11, %p3677_p10 }
  0xd6   : > { %p3673_p9 = pneg %p3672_p7 }
  0xd8   : > { %p3680_p4 = pnand %p3679_p12, %p3673_p9 }
  0xda   : > { %3683 = shalt.err (!%p3680_p4)
}
  0xdb   : > { %s3930_s1 = smov 1   ;;  %s3931_s29 = smov [#allocation13]  }
  0xdc   : > { %3198 = dma.hbm_to_vmem [thread:$0]  (!%p4051_p6), %s4623_s4, 64, %s392_s5, [#allocation9], %s3926_s23, %s3926_s23, %s3930_s1  }
  0xdd   : > { %s418_s0 = sshll.u32 %s3931_s29, 4  ;;  %s3932_s15 = smov [#allocation16]   ;;  %s419_s0 = int_to_ptr.vmem [resolvable:$true] %s418_s0 }
  0xde   : > { %s440_s7 = sshll.u32 %s3932_s15, 4  ;;  %s3684_s19 = scalar_lea.hbm %s4625_s6, 16  ;;  %s441_s7 = int_to_ptr.vmem [resolvable:$true] %s440_s7 }
  0xdf   : > { %p3685_p13 = scmp.ne.s32.totalorder %s4625_s6, %s3684_s19  ;;  %p3691_p0 = scmp.lt.u32.totalorder %s3684_s19, %s4625_s6 }
  0xe1   : > { %p3687_p1 = pnand %p3685_p13, %p4065_p8 }
  0xe3   : > { %p3688_p3 = pneg %p3687_p1 }
  0xe5   : > { %p3693_p2 = pnand %p3691_p0, %p3688_p3 }
  0xe7   : > { %3696 = shalt.err (!%p3693_p2)
}
  0xe8   : > { %s3697_s23 = scalar_lea.vmem %s419_s0, 16  ;;  %s3704_s5 = scalar_lea.vmem %s419_s0, 32 }
  0xe9   : > { %p3698_p5 = scmp.ne.s32.totalorder %s419_s0, %s3697_s23  ;;  %p3705_p10 = scmp.lt.s32.totalorder %s419_s0, %s419_s0 }
  0xea   : > { %p3706_p11 = scmp.lt.s32.totalorder %s3704_s5, %s3697_s23 }
  0xeb   : > { %p3700_p7 = pnand %p3698_p5, %p4065_p8 }
  0xec   : > { %p3707_p12 = por %p3706_p11, %p3705_p10 }
  0xed   : > { %p3701_p9 = pneg %p3700_p7 }
  0xef   : > { %p3708_p4 = pnand %p3707_p12, %p3701_p9 }
  0xf1   : > { %3711 = shalt.err (!%p3708_p4)
}
  0xf2   : > { %3204 = dma.hbm_to_vmem [thread:$0]  (!%p4051_p6), %s4625_s6, 16, %s419_s0, [#allocation12]  }
  0xf3   : > { %s3712_s15 = scalar_lea.hbm %s4627_s8, 16 }
  0xf4   : > { %p3713_p13 = scmp.ne.s32.totalorder %s4627_s8, %s3712_s15  ;;  %p3719_p0 = scmp.lt.u32.totalorder %s3712_s15, %s4627_s8 }
  0xf6   : > { %p3715_p1 = pnand %p3713_p13, %p4065_p8 }
  0xf8   : > { %p3716_p3 = pneg %p3715_p1 }
  0xfa   : > { %p3721_p2 = pnand %p3719_p0, %p3716_p3 }
  0xfc   : > { %3724 = shalt.err (!%p3721_p2)
}
  0xfd   : > { %s3725_s30 = scalar_lea.vmem %s441_s7, 16  ;;  %s3732_s0 = scalar_lea.vmem %s441_s7, 32 }
  0xfe   : > { %p3726_p5 = scmp.ne.s32.totalorder %s441_s7, %s3725_s30  ;;  %p3733_p10 = scmp.lt.s32.totalorder %s441_s7, %s441_s7 }
  0xff   : > { %p3734_p11 = scmp.lt.s32.totalorder %s3732_s0, %s3725_s30 }
 0x100   : > { %p3728_p7 = pnand %p3726_p5, %p4065_p8 }
 0x101   : > { %p3735_p12 = por %p3734_p11, %p3733_p10 }
 0x102   : > { %p3729_p9 = pneg %p3728_p7 }
 0x104   : > { %p3736_p4 = pnand %p3735_p12, %p3729_p9 }
 0x106   : > { %3739 = shalt.err (!%p3736_p4)
}
 0x107   : > { %3210 = dma.hbm_to_vmem [thread:$0]  (!%p4051_p6), %s4627_s8, 16, %s441_s7, [#allocation15]  }
 0x108   : > { %s3933_s23 = smov [#allocation19]   ;;  %s3934_s1 = smov [#allocation22]  }
 0x109   : > { %s464_s5 = sshll.u32 %s3933_s23, 4  ;;  %s488_s24 = sshll.u32 %s3934_s1, 4  ;;  %s465_s5 = int_to_ptr.vmem [resolvable:$true] %s464_s5  ;;  %s489_s24 = int_to_ptr.vmem [resolvable:$true] %s488_s24 }
 0x10a   : > { %s3740_s15 = scalar_lea.hbm %s4629_s10, 64 }
 0x10b   : > { %p3741_p13 = scmp.ne.s32.totalorder %s4629_s10, %s3740_s15  ;;  %p3747_p0 = scmp.lt.u32.totalorder %s3740_s15, %s4629_s10 }
 0x10d   : > { %p3743_p1 = pnand %p3741_p13, %p4065_p8 }
 0x10f   : > { %p3744_p3 = pneg %p3743_p1 }
 0x111   : > { %p3749_p2 = pnand %p3747_p0, %p3744_p3 }
 0x113   : > { %3752 = shalt.err (!%p3749_p2)
}
 0x114   : > { %s3753_s7 = scalar_lea.vmem %s465_s5, 64  ;;  %p3761_p10 = scmp.lt.s32.totalorder %s465_s5, %s465_s5 }
 0x115   : > { %p3754_p5 = scmp.ne.s32.totalorder %s465_s5, %s3753_s7  ;;  %p3762_p11 = scmp.lt.s32.totalorder %s3753_s7, %s3753_s7 }
 0x117   : > { %p3756_p7 = pnand %p3754_p5, %p4065_p8  ;;  %p3763_p12 = por %p3762_p11, %p3761_p10 }
 0x119   : > { %p3757_p9 = pneg %p3756_p7 }
 0x11b   : > { %p3764_p4 = pnand %p3763_p12, %p3757_p9 }
 0x11d   : > { %3767 = shalt.err (!%p3764_p4)
}
 0x11e   : > { %3216 = dma.hbm_to_vmem [thread:$0]  (!%p4051_p6), %s4629_s10, 64, %s465_s5, [#allocation18]  }
 0x11f   : > { %s3768_s23 = scalar_lea.hbm %s4631_s12, 16 }
 0x120   : > { %p3769_p13 = scmp.ne.s32.totalorder %s4631_s12, %s3768_s23  ;;  %p3775_p0 = scmp.lt.u32.totalorder %s3768_s23, %s4631_s12 }
 0x122   : > { %p3771_p1 = pnand %p3769_p13, %p4065_p8 }
 0x124   : > { %p3772_p3 = pneg %p3771_p1 }
 0x126   : > { %p3777_p2 = pnand %p3775_p0, %p3772_p3 }
 0x128   : > { %3780 = shalt.err (!%p3777_p2)
}
 0x129   : > { %s3781_s13 = scalar_lea.vmem %s489_s24, 16  ;;  %s3788_s5 = scalar_lea.vmem %s489_s24, 32 }
 0x12a   : > { %p3782_p5 = scmp.ne.s32.totalorder %s489_s24, %s3781_s13  ;;  %p3789_p10 = scmp.lt.s32.totalorder %s489_s24, %s489_s24 }
 0x12b   : > { %p3790_p11 = scmp.lt.s32.totalorder %s3788_s5, %s3781_s13 }
 0x12c   : > { %p3784_p7 = pnand %p3782_p5, %p4065_p8 }
 0x12d   : > { %p3791_p12 = por %p3790_p11, %p3789_p10 }
 0x12e   : > { %p3785_p9 = pneg %p3784_p7 }
 0x130   : > { %p3792_p4 = pnand %p3791_p12, %p3785_p9 }
 0x132   : > { %3795 = shalt.err (!%p3792_p4)
}
 0x133   : > { %3222 = dma.hbm_to_vmem [thread:$0]  (!%p4051_p6), %s4631_s12, 16, %s489_s24, [#allocation21]  }
 0x134   : > { %s2704_s16 = sadd.s32 4294967294, %s3916_s28   ;;  %s4309_s18 = sadd.s32 1, %s3916_s28  }
 0x135   : > { %s42_s21 = sadd.s32 1, %s3912_s27  ;;  %s39_s7 = ssub.s32 %s3916_s28, %s4309_s18 }
 0x136   : > { %p49_p8 = scmp.ne.s32.totalorder %s3912_s27, %s3908_s26  ;;  %p40_p13 = scmp.eq.s32.totalorder %s39_s7, 0 }
 0x137   : > { %p50_p1 = scmp.eq.s32.totalorder %s3916_s28, 0  ;;  %p55_p3 = scmp.ne.s32.totalorder %s3908_s26, %s3904_s25 }
 0x138   : > { %p331_p0 = scmp.eq.s32.totalorder %s4033_s14, 1  ;;  %p4657_p5 = scmp.eq.s32.totalorder %s4033_s14, 0 }
 0x139   : > { %s4321_s30 = scalar_select %p40_p13, %s3912_s27, %s42_s21  }
 0x13a   : > { %p51_p2 = por %p50_p1, %p49_p8  ;;  %p4325_p7 = por %p4657_p5, %p55_p3 }
 0x13b   : > { %p4329_p6 = por %p331_p0, %p49_p8  ;;  %p337_p9 = scmp.eq.s32.totalorder %s2704_s16, 1 }
 0x13c   : > { %p3243_p10 = scmp.lt.s32.totalorder %s3916_s28, 2  ;;  %s499_s20 = sand.u32 1, %s3912_s27  }
 0x13d   : > { %s4659_s24 = scalar_select %p4329_p6, 1, 0 }
 0x13e   : > { %p4335_p11 = por %p337_p9, %p55_p3  ;;  %s2719_s23 = sshll.u32 %s499_s20, 3 }
 0x13f   : > { %s2720_s1 = sshll.u32 %s3916_s28, 7  ;;  %s4661_s15 = sld [smem:[#allocation33_spill]] }
 0x140   : > { %s4660_s17 = scalar_select %p4335_p11, 1, 0 }
 0x141   : > { %s503_s5 = scalar_lea.vmem [#allocation2], %s2719_s23  ;;  %p4345_p12 = pnand %p3243_p10, %p51_p2 }
 0x142   : > { %s510_s3 = sshll.u32 %s503_s5, 4  ;;  %s500_s16 = scalar_lea.sflag [#allocation3], %s499_s20  ;;  %s4349_s3 = int_to_ptr.vmem [resolvable:$true] %s510_s3 }
 0x143   : > { %p3798_p8 = pneg %p4345_p12 }
 0x145   : > { %s4343_s13 = scalar_lea.hbm %s4661_s15, %s2720_s1  ;;  %s3801_s1 = scalar_lea.hbm %s4661_s15, 256 }
 0x146   : > { %s3796_s21 = scalar_lea.hbm %s4343_s13, 128  ;;  %p3802_p3 = scmp.lt.u32.totalorder %s4343_s13, %s4661_s15 }
 0x147   : > { %p3797_p4 = scmp.ne.s32.totalorder %s4343_s13, %s3796_s21  ;;  %p3803_p0 = scmp.lt.u32.totalorder %s3801_s1, %s3796_s21 }
 0x148   : > { %p3805_p5 = scmp.lt.u32.totalorder %s3796_s21, %s4343_s13 }
 0x149   : > { %p3799_p13 = pnand %p3798_p8, %p3797_p4  ;;  %p3804_p2 = por %p3803_p0, %p3802_p3 }
 0x14b   : > { %p3800_p1 = pneg %p3799_p13  ;;  %p3806_p9 = por %p3805_p5, %p3804_p2 }
 0x14d   : > { %p3807_p10 = pnand %p3806_p9, %p3800_p1 }
 0x14f   : > { %3810 = shalt.err (!%p3807_p10)
}
 0x150   : > { %s3811_s20 = scalar_lea.vmem %s4349_s3, 128  ;;  %s3935_s5 = smov [#allocation2]  }
 0x151   : > { %p3812_p4 = scmp.ne.s32.totalorder %s4349_s3, %s3811_s20  ;;  %s3816_s7 = sshll.u32 %s3935_s5, 4  ;;  %s3817_s7 = int_to_ptr.vmem [resolvable:$false] %s3816_s7 }
 0x152   : > { %s3818_s23 = scalar_lea.vmem %s3817_s7, 256  ;;  %p3819_p6 = scmp.lt.s32.totalorder %s4349_s3, %s3817_s7 }
 0x153   : > { %p3814_p13 = pnand %p3812_p4, %p3798_p8  ;;  %p3820_p3 = scmp.lt.s32.totalorder %s3818_s23, %s3811_s20 }
 0x155   : > { %p3815_p11 = pneg %p3814_p13  ;;  %p3821_p0 = por %p3820_p3, %p3819_p6 }
 0x157   : > { %p3822_p2 = pnand %p3821_p0, %p3815_p11 }
 0x159   : > { %3825 = shalt.err (!%p3822_p2)
}
 0x15a   : > { %3226 = dma.hbm_to_vmem [thread:$0]  (!%p4345_p12), %s4343_s13, 128, %s4349_s3, %s500_s16  }
 0x15b   : > { %s4663_s21 = sld [smem:[#allocation32_spill]] }
 0x161   : > { %p4664_p1 = scmp.ne.s32.totalorder %s4663_s21, 0 }
 0x162   : > { %s4379_s1 = sand.u32 (!%p4664_p1), 1, %s3908_s26  }
 0x163   : > { %519 = sbr.rel (%p4664_p1) target bundleno = 2825 (0xb09), region = 72  ;;  %s2722_s22 = sshll.u32 (!%p4664_p1), %s4379_s1, 3 }
 0x164   : > { %s522_s29 = scalar_lea.sflag (!%p4664_p1), [#allocation3], %s4379_s1  ;;  %s4385_s20 = scalar_lea.vmem (!%p4664_p1), [#allocation2], %s2722_s22 }
 0x16a   : > { %3871 = dma.done.wait (%p4325_p7), %s522_s29, 128  }
 0x16b   : > { %3873 = vsyncadd (%p4325_p7), %s522_s29, 4294967168  ;;  %p4665_p6 = scmp.eq.s32.totalorder %s4033_s14, 0 }
 0x16d   : > { %3875 = dma.done.wait (%p4665_p6), [#allocation6], 32   ;;  %p4666_p11 = pmov %p4665_p6 }
 0x16e   : > { %p4667_p12 = pmov %p4665_p6 }
 0x16f   : > { %3877 = vsyncadd (%p4666_p11), [#allocation6], 4294967264 }
 0x170   : > { %3879 = dma.done.wait (%p4667_p12), [#allocation9], 4160   ;;  %p4668_p8 = pmov %p4665_p6 }
 0x171   : > { %p4669_p5 = pmov %p4665_p6 }
 0x172   : > { %3881 = vsyncadd (%p4668_p8), [#allocation9], 4294963136 }
 0x173   : > { %3883 = dma.done.wait (%p4669_p5), [#allocation12], 1040   ;;  %p4670_p9 = pmov %p4669_p5 }
 0x174   : > { %p4671_p7 = pmov %p4669_p5 }
 0x175   : > { %3885 = vsyncadd (%p4670_p9), [#allocation12], 4294966256 }
 0x176   : > { %3887 = dma.done.wait (%p4671_p7), [#allocation15], 32   ;;  %p4672_p10 = pmov %p4669_p5 }
 0x177   : > { %p4673_p4 = pmov %p4669_p5 }
 0x178   : > { %3889 = vsyncadd (%p4672_p10), [#allocation15], 4294967264 }
 0x179   : > { %3891 = dma.done.wait (%p4673_p4), [#allocation18], 4160   ;;  %p4674_p13 = pmov %p4673_p4 }
 0x17a   : > { %p4675_p3 = pmov %p4673_p4 }
 0x17b   : > { %3893 = vsyncadd (%p4674_p13), [#allocation18], 4294963136 }
 0x17c   : > { %3895 = dma.done.wait (%p4675_p3), [#allocation21], 4112   ;;  %p4676_p0 = pmov %p4675_p3 }
 0x17d   : > { %v617_v0 = vld [vmem:[%s4385_s20] sm:$0xff]  ;;  %v3311_v1 = vld [vmem:[#allocation8] sm:$0xff]   ;;  %v3936_v3 = vmov 0.0   ;;  %vm3937_vm0 = vmmov 0   ;;  %v2736_v26 = vld [vmem:[#allocation5] ss:$0 sm:$0xff] }
 0x17e   : > { %3897 = vsyncadd (%p4676_p0), [#allocation21], 4294963184  ;;  %620 = vadd.xlane.f32.xlu0 %v617_v0  ;;  %v3312_v2 = vld [vmem:[#allocation8 + $0x40] sm:$0xff]   ;;  %2974 = vmatprep.subr.bf16.mxu0 %v3936_v3  ;;  %v3313_v4 = vld [vmem:[#allocation8 + $0x8] sm:$0xff]   ;;  %s3938_s0 = smov 96   ;;  %vm1098_vm1 = vcmask 261120  }
 0x17f   : > { %2994 = vmatprep.subr.bf16.mxu1 %v3936_v3  ;;  %v3314_v5 = vld [vmem:[#allocation8 + $0x48] sm:$0xff]   ;;  %2975 = vmatpush3.bf16.msra.mxu0 %v3311_v1  ;;  %v3315_v6 = vld [vmem:[#allocation8 + $0x10] sm:$0xff]   ;;  %v3317_v12 = vld [vmem:[#allocation8 + $0x18] sm:$0xff]   ;;  %vm1303_vm3 = vcmask 64512   ;;  %s3939_s13 = smov 64   ;;  %vm1357_vm4 = vcmask 1043456  }
 0x180   : > { %2995 = vmatpush3.bf16.msra.mxu1 %v3312_v2  ;;  %2976 = vmatprep.subr.bf16.mxu0 %v3936_v3  ;;  %v3316_v7 = vld [vmem:[#allocation8 + $0x50] sm:$0xff]   ;;  %v3318_v13 = vld [vmem:[#allocation8 + $0x58] sm:$0xff]   ;;  %v3319_v14 = vld [vmem:[#allocation8 + $0x20] sm:$0xff]   ;;  %s2863_s3 = sshll.u32 %s4033_s14, 7  ;;  %s615_s19 = scalar_lea.vmem [#allocation23], %s2722_s22 }
 0x181   : > { %2996 = vmatprep.subr.bf16.mxu1 %v3936_v3  ;;  %v3320_v15 = vld [vmem:[#allocation8 + $0x60] sm:$0xff]   ;;  %2990 = vmatprep.mubr.msk.bf16.mxu0 %vm3937_vm0, %v3936_v3  ;;  %v3321_v16 = vld [vmem:[#allocation8 + $0x28] sm:$0xff]   ;;  %v3323_v18 = vld [vmem:[#allocation8 + $0x30] sm:$0xff]   ;;  %s2520_s16 = sshll.u32 %s615_s19, 4  ;;  %s4677_s23 = sld [smem:[#allocation38_spill]]  ;;  %s4577_s16 = int_to_ptr.vmem [resolvable:$true] %s2520_s16 }
 0x182   : > { %3010 = vmatprep.mubr.msk.bf16.mxu1 %vm3937_vm0, %v3936_v3  ;;  %v3322_v17 = vld [vmem:[#allocation8 + $0x68] sm:$0xff]   ;;  %v3324_v19 = vld [vmem:[#allocation8 + $0x70] sm:$0xff]   ;;  %v3325_v20 = vld [vmem:[#allocation8 + $0x38] sm:$0xff]   ;;  %s2507_s29 = scalar_lea.sflag [#allocation4], %s4379_s1  ;;  %p4678_p1 = scmp.ne.s32.totalorder %s4659_s24, 0 }
 0x183   : > { %2977 = vmatpush3.bf16.msra.mxu0 %v3313_v4  ;;  %v3326_v21 = vld [vmem:[#allocation8 + $0x78] sm:$0xff]   ;;  %v3327_v31 = vld [vmem:[#allocation8 + $0x80] sm:$0xff]   ;;  %v3329_v34 = vld [vmem:[#allocation8 + $0x88] sm:$0xff]   ;;  %s3941_s14 = smov [#allocation23]  }
 0x184   : > { %2997 = vmatpush3.bf16.msra.mxu1 %v3314_v5  ;;  %2978 = vmatprep.subr.bf16.mxu0 %v3936_v3  ;;  %v2737_v28 = vld [vmem:[#allocation7] ss:$0 sm:$0xff]  ;;  %v3328_v32 = vld [vmem:[#allocation8 + $0xc0] sm:$0xff]   ;;  %v3330_v35 = vld [vmem:[#allocation8 + $0xc8] sm:$0xff]   ;;  %s3830_s22 = sshll.u32 %s3941_s14, 4  ;;  %s3831_s22 = int_to_ptr.vmem [resolvable:$false] %s3830_s22 }
 0x185   : > { %2998 = vmatprep.subr.bf16.mxu1 %v3936_v3  ;;  %v3331_v36 = vld [vmem:[#allocation8 + $0x90] sm:$0xff]   ;;  %v3333_v38 = vld [vmem:[#allocation8 + $0x98] sm:$0xff]   ;;  %v3335_v40 = vld [vmem:[#allocation8 + $0xa0] sm:$0xff]   ;;  %p3833_p12 = scmp.lt.s32.totalorder %s4577_s16, %s3831_s22 }
 0x186   : > { %v3332_v37 = vld [vmem:[#allocation8 + $0xd0] sm:$0xff]   ;;  %v3334_v39 = vld [vmem:[#allocation8 + $0xd8] sm:$0xff]   ;;  %v3336_v41 = vld [vmem:[#allocation8 + $0xe0] sm:$0xff]  }
 0x187   : > { %2979 = vmatpush3.bf16.msra.mxu0 %v3315_v6  ;;  %v3337_v42 = vld [vmem:[#allocation8 + $0xa8] sm:$0xff]   ;;  %v3339_v44 = vld [vmem:[#allocation8 + $0xb0] sm:$0xff]   ;;  %v3341_v46 = vld [vmem:[#allocation8 + $0xb8] sm:$0xff]   ;;  %s4575_s21 = scalar_lea.hbm %s4677_s23, %s2863_s3 }
 0x188   : > { %2999 = vmatpush3.bf16.msra.mxu1 %v3316_v7  ;;  %2980 = vmatprep.subr.bf16.mxu0 %v3936_v3  ;;  %v3338_v43 = vld [vmem:[#allocation8 + $0xe8] sm:$0xff]   ;;  %v3340_v45 = vld [vmem:[#allocation8 + $0xf0] sm:$0xff]   ;;  %v3342_v47 = vld [vmem:[#allocation8 + $0xf8] sm:$0xff]  }
 0x189   : > { %3000 = vmatprep.subr.bf16.mxu1 %v3936_v3  ;;  %v2738_v48 = vld [vmem:[#allocation10] ss:$0 sm:$0xff]  ;;  %v2739_v50 = vld [vmem:[#allocation10 + $0x1] ss:$0 sm:$0xff]  ;;  %v2740_v62 = vld [vmem:[#allocation10 + $0x2] ss:$0 sm:$0xff] }
 0x18a   : > { %v2741_v63 = vld [vmem:[#allocation10 + $0x3] ss:$0 sm:$0xff] }
 0x18b   : > { %2981 = vmatpush3.bf16.msra.mxu0 %v3317_v12 }
 0x18c   : > { %3001 = vmatpush3.bf16.msra.mxu1 %v3318_v13  ;;  %2982 = vmatprep.subr.bf16.mxu0 %v3936_v3 }
 0x18d   : > { %3002 = vmatprep.subr.bf16.mxu1 %v3936_v3 }
 0x18f   : > { %2983 = vmatpush3.bf16.msra.mxu0 %v3319_v14 }
 0x190   : > { %3003 = vmatpush3.bf16.msra.mxu1 %v3320_v15  ;;  %2984 = vmatprep.subr.bf16.mxu0 %v3936_v3 }
 0x191   : > { %3004 = vmatprep.subr.bf16.mxu1 %v3936_v3 }
 0x193   : > { %2985 = vmatpush3.bf16.msra.mxu0 %v3321_v16 }
 0x194   : > { %3005 = vmatpush3.bf16.msra.mxu1 %v3322_v17  ;;  %2986 = vmatprep.subr.bf16.mxu0 %v3936_v3 }
 0x195   : > { %3006 = vmatprep.subr.bf16.mxu1 %v3936_v3 }
 0x197   : > { %2987 = vmatpush3.bf16.msra.mxu0 %v3323_v18 }
 0x198   : > { %3007 = vmatpush3.bf16.msra.mxu1 %v3324_v19  ;;  %2988 = vmatprep.subr.bf16.mxu0 %v3936_v3 }
 0x199   : > { %3008 = vmatprep.subr.bf16.mxu1 %v3936_v3 }
 0x19b   : > { %2989 = vmatpush3.bf16.msra.mxu0 %v3325_v20 }
 0x19c   : > { %3009 = vmatpush3.bf16.msra.mxu1 %v3326_v21  ;;  %3014 = vmatprep.subr.bf16.mxu0 %v3936_v3  ;;  %v1292_v21 = vlaneseq }
 0x19d   : > { %3034 = vmatprep.subr.bf16.mxu1 %v3936_v3 }
 0x20b   : > { %v621_v8 = vpop.xlane.xlu0 %620 }
 0x20c   : > { %v623_v9 = vmul.f32 0.0078125, %v621_v8 }
 0x20e   : > { %v624_v10 = vsub.f32 %v617_v0, %v623_v9 }
 0x210   : > { %v625_v11 = vmul.f32 %v624_v10, %v624_v10 }
 0x212   : > { %626 = vadd.xlane.f32.xlu0 %v625_v11 }
 0x29f   : > { %v627_v22 = vpop.xlane.xlu0 %626 }
 0x2a0   : > { %v628_v23 = vmul.f32 0.0078125, %v627_v22  ;;  %v4498_v22 = vshrl.u32 %v1292_v21, 7 }
 0x2a2   : > { %v629_v24 = vadd.f32 1e-05, %v628_v23  ;;  %v1295_v23 = vand.u32 127, %v1292_v21 }
 0x2a4   : > { %3431 = vrsqrt.f32 %v629_v24  ;;  %vm1296_vm2 = vcmp.le.s32.totalorder %v1295_v23, %v4498_v22 }
 0x2ae   : > { %v3432_v25 = vpop.eup %3431 }
 0x2af   : > { %v631_v27 = vmul.f32 %v3432_v25, %v624_v10 }
 0x2b1   : > { %v638_v29 = vmul.f32 %v2736_v26, %v631_v27 }
 0x2b3   : > { %v645_v30 = vadd.f32 %v2737_v28, %v638_v29 }
 0x2b5   : > { %v646_v33 = vpack.c.bf16 %v645_v30, %v645_v30 }
 0x2b7   : > { %2991 = vmatmul.mubr.bf16.vlgmr.msra.gmra.mrb[0].mxu0 %v646_v33  ;;  %3011 = vmatmul.mubr.bf16.vlgmr.msra.gmra.mrb[0].mxu1 %v646_v33 }
 0x2b8   : > { %3015 = vmatpush3.bf16.msra.mxu0 %v3327_v31  ;;  %3035 = vmatpush3.bf16.msra.mxu1 %v3328_v32 }
 0x2b9   : > { %3016 = vmatprep.subr.bf16.mxu0 %v3936_v3  ;;  %3036 = vmatprep.subr.bf16.mxu1 %v3936_v3 }
 0x2ba   : > { %3030 = vmatprep.mubr.msk.bf16.mxu0 %vm3937_vm0, %v3936_v3  ;;  %3050 = vmatprep.mubr.msk.bf16.mxu1 %vm3937_vm0, %v3936_v3 }
 0x2bc   : > { %3017 = vmatpush3.bf16.msra.mxu0 %v3329_v34  ;;  %3037 = vmatpush3.bf16.msra.mxu1 %v3330_v35 }
 0x2bd   : > { %3018 = vmatprep.subr.bf16.mxu0 %v3936_v3  ;;  %3038 = vmatprep.subr.bf16.mxu1 %v3936_v3 }
 0x2c0   : > { %3019 = vmatpush3.bf16.msra.mxu0 %v3331_v36  ;;  %3039 = vmatpush3.bf16.msra.mxu1 %v3332_v37 }
 0x2c1   : > { %3020 = vmatprep.subr.bf16.mxu0 %v3936_v3  ;;  %3040 = vmatprep.subr.bf16.mxu1 %v3936_v3 }
 0x2c4   : > { %3021 = vmatpush3.bf16.msra.mxu0 %v3333_v38  ;;  %3041 = vmatpush3.bf16.msra.mxu1 %v3334_v39 }
 0x2c5   : > { %3022 = vmatprep.subr.bf16.mxu0 %v3936_v3  ;;  %3042 = vmatprep.subr.bf16.mxu1 %v3936_v3 }
 0x2c8   : > { %3023 = vmatpush3.bf16.msra.mxu0 %v3335_v40  ;;  %3043 = vmatpush3.bf16.msra.mxu1 %v3336_v41 }
 0x2c9   : > { %3024 = vmatprep.subr.bf16.mxu0 %v3936_v3  ;;  %3044 = vmatprep.subr.bf16.mxu1 %v3936_v3 }
 0x2cc   : > { %3025 = vmatpush3.bf16.msra.mxu0 %v3337_v42  ;;  %3045 = vmatpush3.bf16.msra.mxu1 %v3338_v43 }
 0x2cd   : > { %3026 = vmatprep.subr.bf16.mxu0 %v3936_v3  ;;  %3046 = vmatprep.subr.bf16.mxu1 %v3936_v3 }
 0x2d0   : > { %3027 = vmatpush3.bf16.msra.mxu0 %v3339_v44  ;;  %3047 = vmatpush3.bf16.msra.mxu1 %v3340_v45 }
 0x2d1   : > { %3028 = vmatprep.subr.bf16.mxu0 %v3936_v3  ;;  %3048 = vmatprep.subr.bf16.mxu1 %v3936_v3 }
 0x2d4   : > { %3029 = vmatpush3.bf16.msra.mxu0 %v3341_v46  ;;  %3049 = vmatpush3.bf16.msra.mxu1 %v3342_v47 }
 0x2d5   : > { %3054 = vmatprep.subr.bf16.mxu0 %v3936_v3  ;;  %3060 = vmatprep.subr.bf16.mxu1 %v3936_v3 }
 0x2d7   : > { %3031 = vmatmul.mubr.bf16.vlgmr.msra.gmra.mrb[4].mxu0 %v646_v33  ;;  %3051 = vmatmul.mubr.bf16.vlgmr.msra.gmra.mrb[4].mxu1 %v646_v33 }
 0x2d8   : > { %3056 = vmatprep.mubr.msk.bf16.mxu0 %vm3937_vm0, %v3936_v3  ;;  %3062 = vmatprep.mubr.msk.bf16.mxu1 %vm3937_vm0, %v3936_v3 }
 0x38a   : > { %v821_v49 = vpop.f32.mrb[0].mxu0  ;;  %v909_v51 = vpop.f32.mrb[0].mxu1 }
 0x38b   : > { %v822_v52 = vadd.f32 %v2738_v48, %v821_v49  ;;  %v2992_v53 = vpop.f32.mrb[1].mxu0  ;;  %v3012_v54 = vpop.f32.mrb[1].mxu1  ;;  %v910_v58 = vadd.f32 %v2739_v50, %v909_v51 }
 0x38c   : > { %v824_v55 = vpop.f32.mrb[2].mxu0  ;;  %v912_v56 = vpop.f32.mrb[2].mxu1 }
 0x38d   : > { %v4462_v57 = vpack.c.bf16 %v822_v52, %v822_v52  ;;  %v2993_v59 = vpop.f32.mrb[3].mxu0  ;;  %v3013_v60 = vpop.f32.mrb[3].mxu1  ;;  %v4465_v61 = vpack.c.bf16 %v910_v58, %v910_v58 }
 0x38f   : > { %1096 = vrot.lane.b32.xlu1 %v4462_v57, %s3938_s0 }
 0x393   : > { %1146 = vrot.lane.b32.xlu1 %v4465_v61, %s3938_s0 }
 0x3aa   : > { %v997_v0 = vpop.f32.mrb[4].mxu0  ;;  %v1085_v1 = vpop.f32.mrb[4].mxu1 }
 0x3ab   : > { %v998_v2 = vadd.f32 %v2740_v62, %v997_v0  ;;  %v1086_v4 = vadd.f32 %v2741_v63, %v1085_v1  ;;  %v3032_v5 = vpop.f32.mrb[5].mxu0  ;;  %v3052_v6 = vpop.f32.mrb[5].mxu1 }
 0x3ac   : > { %v1000_v7 = vpop.f32.mrb[6].mxu0  ;;  %v1088_v8 = vpop.f32.mrb[6].mxu1 }
 0x3ad   : > { %v4468_v9 = vpack.c.bf16 %v998_v2, %v998_v2  ;;  %v4470_v10 = vpack.c.bf16 %v1086_v4, %v1086_v4  ;;  %v3033_v11 = vpop.f32.mrb[7].mxu0  ;;  %v3053_v12 = vpop.f32.mrb[7].mxu1 }
 0x3af   : > { %1244 = vrot.lane.b32.xlu1 %v4470_v10, %s3938_s0  ;;  %1195 = vrot.lane.b32.xlu0 %v4468_v9, %s3938_s0  ;;  %s3832_s0 = scalar_lea.vmem %s3831_s22, 256 }
 0x401   : > { %v1097_v13 = vpop.permute.xlu1 %1096 }
 0x402   : > { %v1103_v14 = vsel %vm1098_vm1, %v1097_v13, 0 }
 0x403   : > { %3055 = vmatpush3.bf16.xpose.msra.mxu0 %v1103_v14 }
 0x404   : > { %3066 = vmatprep.subr.bf16.mxu0 %v3936_v3 }
 0x405   : > { %v1147_v15 = vpop.permute.xlu1 %1146 }
 0x406   : > { %v1152_v16 = vsel %vm1098_vm1, %v1147_v15, 0 }
 0x407   : > { %3061 = vmatpush3.bf16.xpose.msra.mxu1 %v1152_v16 }
 0x408   : > { %3072 = vmatprep.subr.bf16.mxu1 %v3936_v3 }
 0x40a   : > { %3057 = vmatmul.mubr.msk.bf16.vlgmr.msra.gmra.mrb[8].mxu0 %vm1098_vm1, %v4462_v57 }
 0x40b   : > { %3068 = vmatprep.mubr.msk.bf16.mxu0 %vm3937_vm0, %v3936_v3 }
 0x40e   : > { %3063 = vmatmul.mubr.msk.bf16.vlgmr.msra.gmra.mrb[8].mxu1 %vm1098_vm1, %v4465_v61 }
 0x40f   : > { %3074 = vmatprep.mubr.msk.bf16.mxu1 %vm3937_vm0, %v3936_v3 }
 0x421   : > { %v1245_v17 = vpop.permute.xlu1 %1244  ;;  %v1196_v18 = vpop.permute.xlu0 %1195 }
 0x422   : > { %v1250_v19 = vsel %vm1098_vm1, %v1245_v17, 0  ;;  %v1201_v20 = vsel %vm1098_vm1, %v1196_v18, 0 }
 0x423   : > { %3067 = vmatpush3.bf16.xpose.msra.mxu0 %v1201_v20  ;;  %3073 = vmatpush3.bf16.xpose.msra.mxu1 %v1250_v19 }
 0x424   : > { %3078 = vmatprep.subr.bf16.mxu0 %v3936_v3  ;;  %3084 = vmatprep.subr.bf16.mxu1 %v3936_v3 }
 0x42a   : > { %3069 = vmatmul.mubr.msk.bf16.vlgmr.msra.gmra.mrb[12].mxu0 %vm1098_vm1, %v4468_v9  ;;  %3075 = vmatmul.mubr.msk.bf16.vlgmr.msra.gmra.mrb[12].mxu1 %vm1098_vm1, %v4470_v10 }
 0x42b   : > { %3080 = vmatprep.mubr.msk.bf16.mxu0 %vm3937_vm0, %v3936_v3  ;;  %3086 = vmatprep.mubr.msk.bf16.mxu1 %vm3937_vm0, %v3936_v3 }
 0x4dd   : > { %v1139_v24 = vpop.f32.mrb[8].mxu0 }
 0x4de   : > { %v1299_v25 = vsel %vm1296_vm2, %v1139_v24, -inf  ;;  %v3058_v26 = vpop.f32.mrb[9].mxu0 }
 0x4df   : > { %v1142_v27 = vpop.f32.mrb[10].mxu0  ;;  %v1304_v28 = vsel %vm1303_vm3, %v1299_v25, -inf  ;;  %v3343_v26 = vld [vmem:[#allocation11] sm:$0xff]  }
 0x4e0   : > { %1305 = vmax.xlane.f32.xlu1 %v1304_v28  ;;  %v3059_v29 = vpop.f32.mrb[11].mxu0 }
 0x4e1   : > { %v1188_v30 = vpop.f32.mrb[8].mxu1 }
 0x4e2   : > { %v1300_v31 = vsel %vm1296_vm2, %v1188_v30, -inf  ;;  %v3064_v32 = vpop.f32.mrb[9].mxu1 }
 0x4e3   : > { %v1191_v33 = vpop.f32.mrb[10].mxu1  ;;  %v1307_v34 = vsel %vm1303_vm3, %v1300_v31, -inf  ;;  %v3345_v32 = vld [vmem:[#allocation11 + $0x10] sm:$0xff]  }
 0x4e4   : > { %v3065_v35 = vpop.f32.mrb[11].mxu1  ;;  %1308 = vmax.xlane.f32.xlu0 %v1307_v34  ;;  %v3346_v33 = vld [vmem:[#allocation11 + $0x18] sm:$0xff]  }
 0x4e5   : > { %v3347_v35 = vld [vmem:[#allocation11 + $0x20] sm:$0xff]  }
 0x4fa   : > { %1352 = vrot.lane.b32.xlu0 %v4462_v57, %s3939_s13 }
 0x4fd   : > { %v1237_v36 = vpop.f32.mrb[12].mxu0  ;;  %v1286_v37 = vpop.f32.mrb[12].mxu1 }
 0x4fe   : > { %v1301_v38 = vsel %vm1296_vm2, %v1237_v36, -inf  ;;  %v3070_v39 = vpop.f32.mrb[13].mxu0  ;;  %v3076_v40 = vpop.f32.mrb[13].mxu1  ;;  %v1302_v44 = vsel %vm1296_vm2, %v1286_v37, -inf }
 0x4ff   : > { %v1240_v41 = vpop.f32.mrb[14].mxu0  ;;  %v1289_v42 = vpop.f32.mrb[14].mxu1  ;;  %v1310_v43 = vsel %vm1303_vm3, %v1301_v38, -inf  ;;  %v1313_v47 = vsel %vm1303_vm3, %v1302_v44, -inf }
 0x500   : > { %v3077_v45 = vpop.f32.mrb[15].mxu1  ;;  %1311 = vmax.xlane.f32.xlu1 %v1310_v43  ;;  %v3071_v46 = vpop.f32.mrb[15].mxu0  ;;  %v3348_v41 = vld [vmem:[#allocation11 + $0x28] sm:$0xff]   ;;  %v3349_v42 = vld [vmem:[#allocation11 + $0x30] sm:$0xff]  }
 0x504   : > { %1314 = vmax.xlane.f32.xlu1 %v1313_v47  ;;  %v3350_v47 = vld [vmem:[#allocation11 + $0x38] sm:$0xff]  }
 0x515   : > { %1401 = vrot.lane.b32.xlu1 %v4465_v61, %s3939_s13 }
 0x56d   : > { %v1306_v48 = vpop.xlane.xlu1 %1305 }
 0x56e   : > { %v1316_v49 = vsub.f32 %v1299_v25, %v1306_v48 }
 0x570   : > { %v1320_v50 = vmul.f32 1.442695, %v1316_v49 }
 0x571   : > { %v1309_v51 = vpop.xlane.xlu0 %1308 }
 0x572   : > { %3433 = vpow2.f32 %v1320_v50  ;;  %v1317_v52 = vsub.f32 %v1300_v31, %v1309_v51  ;;  %v3344_v31 = vld [vmem:[#allocation11 + $0x8] sm:$0xff]  }
 0x574   : > { %v1322_v53 = vmul.f32 1.442695, %v1317_v52 }
 0x575   : > { %v1353_v54 = vpop.permute.xlu0 %1352 }
 0x576   : > { %3435 = vpow2.f32 %v1322_v53  ;;  %v1359_v55 = vsel %vm1357_vm4, %v1353_v54, 0 }
 0x577   : > { %3079 = vmatpush3.bf16.msra.mxu0 %v1359_v55 }
 0x578   : > { %3090 = vmatprep.subr.bf16.mxu0 %v3936_v3 }
 0x57c   : > { %v3434_v56 = vpop.eup %3433 }
 0x57d   : > { %v1328_v57 = vsel %vm1303_vm3, %v3434_v56, 0.0 }
 0x57e   : > { %1329 = vadd.xlane.f32.xlu1 %v1328_v57 }
 0x580   : > { %v3436_v58 = vpop.eup %3435 }
 0x581   : > { %v1331_v59 = vsel %vm1303_vm3, %v3436_v58, 0.0 }
 0x582   : > { %1332 = vadd.xlane.f32.xlu1 %v1331_v59 }
 0x58d   : > { %v1312_v60 = vpop.xlane.xlu1 %1311 }
 0x58e   : > { %v1318_v61 = vsub.f32 %v1301_v38, %v1312_v60 }
 0x590   : > { %v1324_v62 = vmul.f32 1.442695, %v1318_v61 }
 0x591   : > { %v1315_v63 = vpop.xlane.xlu1 %1314 }
 0x592   : > { %3437 = vpow2.f32 %v1324_v62  ;;  %v1319_v0 = vsub.f32 %v1302_v44, %v1315_v63 }
 0x594   : > { %v1326_v1 = vmul.f32 1.442695, %v1319_v0 }
 0x595   : > { %v1402_v2 = vpop.permute.xlu1 %1401 }
 0x596   : > { %3439 = vpow2.f32 %v1326_v1  ;;  %v1407_v4 = vsel %vm1357_vm4, %v1402_v2, 0 }
 0x597   : > { %3085 = vmatpush3.bf16.msra.mxu1 %v1407_v4 }
 0x598   : > { %3096 = vmatprep.subr.bf16.mxu1 %v3936_v3 }
 0x59c   : > { %v3438_v5 = vpop.eup %3437 }
 0x59d   : > { %v1334_v6 = vsel %vm1303_vm3, %v3438_v5, 0.0 }
 0x59e   : > { %1335 = vadd.xlane.f32.xlu0 %v1334_v6 }
 0x5a0   : > { %v3440_v7 = vpop.eup %3439 }
 0x5a1   : > { %v1337_v8 = vsel %vm1303_vm3, %v3440_v7, 0.0 }
 0x5a2   : > { %1338 = vadd.xlane.f32.xlu1 %v1337_v8 }
 0x5b3   : > { %1449 = vrot.lane.b32.xlu1 %v4468_v9, %s3939_s13 }
 0x5b4   : > { %1497 = vrot.lane.b32.xlu0 %v4470_v10, %s3939_s13 }
 0x60b   : > { %v1330_v11 = vpop.xlane.xlu1 %1329 }
 0x60c   : > { %3441 = vrcp.f32 %v1330_v11 }
 0x60f   : > { %v1333_v12 = vpop.xlane.xlu1 %1332 }
 0x610   : > { %3443 = vrcp.f32 %v1333_v12 }
 0x616   : > { %v3442_v13 = vpop.eup %3441 }
 0x617   : > { %v1344_v14 = vmul.f32 %v3442_v13, %v3434_v56 }
 0x619   : > { %v1348_v15 = vpack.c.bf16 %v1344_v14, %v1344_v14  ;;  %v2794_v14 = vld [vmem:[#allocation13] ss:$0 sm:$0xff] }
 0x61a   : > { %v3444_v16 = vpop.eup %3443 }
 0x61b   : > { %v1345_v17 = vmul.f32 %v3444_v16, %v3436_v58  ;;  %3081 = vmatmul.mubr.msk.bf16.vlgmr.msra.gmra.mrb[16].mxu0 %vm1303_vm3, %v1348_v15  ;;  %v3459_v15 = vld [vmem:[%s4385_s20] sm:$0xff]  ;;  %s3826_s20 = scalar_lea.vmem %s4577_s16, 128 }
 0x61c   : > { %3092 = vmatprep.mubr.msk.bf16.mxu0 %vm3937_vm0, %v3936_v3  ;;  %p3827_p2 = scmp.ne.s32.totalorder %s4577_s16, %s3826_s20  ;;  %p3834_p8 = scmp.lt.s32.totalorder %s3832_s0, %s3826_s20 }
 0x61d   : > { %v1349_v18 = vpack.c.bf16 %v1345_v17, %v1345_v17 }
 0x61e   : > { %p3828_p6 = pnand %p3827_p2, %p4678_p1  ;;  %p3835_p5 = por %p3834_p8, %p3833_p12 }
 0x61f   : > { %3087 = vmatmul.mubr.msk.bf16.vlgmr.msra.gmra.mrb[16].mxu1 %vm1303_vm3, %v1349_v18 }
 0x620   : > { %3098 = vmatprep.mubr.msk.bf16.mxu1 %vm3937_vm0, %v3936_v3  ;;  %p3829_p11 = pneg %p3828_p6 }
 0x622   : > { %p3836_p9 = pnand %p3835_p5, %p3829_p11 }
 0x62b   : > { %v1336_v9 = vpop.xlane.xlu0 %1335 }
 0x62c   : > { %3445 = vrcp.f32 %v1336_v9  ;;  %v3351_v9 = vld [vmem:[#allocation17] ss:$16 sps:$4 sm:$0xff]  }
 0x62f   : > { %v1498_v10 = vpop.permute.xlu0 %1497  ;;  %v1339_v19 = vpop.xlane.xlu1 %1338 }
 0x630   : > { %v1503_v20 = vsel %vm1357_vm4, %v1498_v10, 0  ;;  %3447 = vrcp.f32 %v1339_v19  ;;  %v3353_v10 = vld [vmem:[#allocation17 + $0x4] ss:$16 sps:$4 sm:$0xff]   ;;  %v3354_v19 = vld [vmem:[#allocation17 + $0x8] ss:$16 sps:$4 sm:$0xff]  }
 0x631   : > { %3097 = vmatpush3.bf16.msra.mxu1 %v1503_v20  ;;  %v3356_v20 = vld [vmem:[#allocation17 + $0xc] ss:$16 sps:$4 sm:$0xff]  }
 0x632   : > { %3110 = vmatprep.subr.bf16.mxu1 %v3936_v3 }
 0x633   : > { %v1450_v21 = vpop.permute.xlu1 %1449 }
 0x634   : > { %v1455_v23 = vsel %vm1357_vm4, %v1450_v21, 0  ;;  %v3359_v21 = vld [vmem:[#allocation17 + $0x24] ss:$16 sps:$4 sm:$0xff]  }
 0x635   : > { %3091 = vmatpush3.bf16.msra.mxu0 %v1455_v23  ;;  %v3362_v23 = vld [vmem:[#allocation17 + $0x2c] ss:$16 sps:$4 sm:$0xff]  }
 0x636   : > { %v3446_v24 = vpop.eup %3445  ;;  %3102 = vmatprep.subr.bf16.mxu0 %v3936_v3 }
 0x637   : > { %v1346_v25 = vmul.f32 %v3446_v24, %v3438_v5  ;;  %v3357_v24 = vld [vmem:[#allocation17 + $0x20] ss:$16 sps:$4 sm:$0xff]  }
 0x639   : > { %v1350_v27 = vpack.c.bf16 %v1346_v25, %v1346_v25  ;;  %v3360_v25 = vld [vmem:[#allocation17 + $0x28] ss:$16 sps:$4 sm:$0xff]  }
 0x63a   : > { %v3448_v28 = vpop.eup %3447 }
 0x63b   : > { %v1347_v29 = vmul.f32 %v3448_v28, %v3440_v7  ;;  %3093 = vmatmul.mubr.msk.bf16.vlgmr.msra.gmra.mrb[20].mxu0 %vm1303_vm3, %v1350_v27  ;;  %v3368_v27 = vld [vmem:[#allocation17 + $0x4c] ss:$16 sps:$4 sm:$0xff]   ;;  %v3363_v28 = vld [vmem:[#allocation17 + $0x40] ss:$16 sps:$4 sm:$0xff]  }
 0x63c   : > { %3103 = vmatpush3.bf16.msra.mxu0 %v3343_v26  ;;  %3106 = vmatprep.mubr.msk.bf16.mxu0 %vm3937_vm0, %v3936_v3  ;;  %v3365_v26 = vld [vmem:[#allocation17 + $0x44] ss:$16 sps:$4 sm:$0xff]  }
 0x63d   : > { %v1351_v30 = vpack.c.bf16 %v1347_v29, %v1347_v29  ;;  %3104 = vmatprep.subr.bf16.mxu0 %v3936_v3  ;;  %v3366_v29 = vld [vmem:[#allocation17 + $0x48] ss:$16 sps:$4 sm:$0xff]  }
 0x63f   : > { %3099 = vmatmul.mubr.msk.bf16.vlgmr.msra.gmra.mrb[20].mxu1 %vm1303_vm3, %v1351_v30 }
 0x640   : > { %3114 = vmatprep.mubr.msk.bf16.mxu1 %vm3937_vm0, %v3936_v3  ;;  %3105 = vmatpush3.bf16.msra.mxu0 %v3344_v31 }
 0x641   : > { %3111 = vmatpush3.bf16.msra.mxu1 %v3345_v32  ;;  %3118 = vmatprep.subr.bf16.mxu0 %v3936_v3 }
 0x642   : > { %3112 = vmatprep.subr.bf16.mxu1 %v3936_v3 }
 0x645   : > { %3113 = vmatpush3.bf16.msra.mxu1 %v3346_v33 }
 0x646   : > { %3126 = vmatprep.subr.bf16.mxu1 %v3936_v3 }
 0x6ee   : > { %v1395_v34 = vpop.f32.mrb[16].mxu0 }
 0x6ef   : > { %v1545_v36 = vpack.c.bf16 %v1395_v34, %v1395_v34  ;;  %v3082_v37 = vpop.f32.mrb[17].mxu0  ;;  %v3371_v34 = vld [vmem:[#allocation17 + $0x64] ss:$16 sps:$4 sm:$0xff]  }
 0x6f0   : > { %v1398_v38 = vpop.f32.mrb[18].mxu0  ;;  %v3372_v37 = vld [vmem:[#allocation17 + $0x68] ss:$16 sps:$4 sm:$0xff]  }
 0x6f1   : > { %v3083_v39 = vpop.f32.mrb[19].mxu0  ;;  %3107 = vmatmul.mubr.msk.bf16.vlgmr.msra.gmra.mrb[24].mxu0 %vm1098_vm1, %v1545_v36  ;;  %v3369_v36 = vld [vmem:[#allocation17 + $0x60] ss:$16 sps:$4 sm:$0xff]   ;;  %v3377_v38 = vld [vmem:[#allocation17 + $0x84] ss:$16 sps:$4 sm:$0xff]  }
 0x6f2   : > { %v1443_v40 = vpop.f32.mrb[16].mxu1  ;;  %3119 = vmatpush3.bf16.msra.mxu0 %v3347_v35  ;;  %3122 = vmatprep.mubr.msk.bf16.mxu0 %vm3937_vm0, %v3936_v3  ;;  %v3374_v35 = vld [vmem:[#allocation17 + $0x6c] ss:$16 sps:$4 sm:$0xff]  }
 0x6f3   : > { %v1546_v43 = vpack.c.bf16 %v1443_v40, %v1443_v40  ;;  %v3088_v44 = vpop.f32.mrb[17].mxu1  ;;  %3120 = vmatprep.subr.bf16.mxu0 %v3936_v3  ;;  %v3380_v39 = vld [vmem:[#allocation17 + $0x8c] ss:$16 sps:$4 sm:$0xff]   ;;  %v3375_v40 = vld [vmem:[#allocation17 + $0x80] ss:$16 sps:$4 sm:$0xff]  }
 0x6f4   : > { %v1446_v45 = vpop.f32.mrb[18].mxu1  ;;  %v3381_v44 = vld [vmem:[#allocation17 + $0xa0] ss:$16 sps:$4 sm:$0xff]  }
 0x6f5   : > { %v3089_v46 = vpop.f32.mrb[19].mxu1  ;;  %3115 = vmatmul.mubr.msk.bf16.vlgmr.msra.gmra.mrb[24].mxu1 %vm1098_vm1, %v1546_v43  ;;  %v3386_v43 = vld [vmem:[#allocation17 + $0xac] ss:$16 sps:$4 sm:$0xff]   ;;  %v3384_v45 = vld [vmem:[#allocation17 + $0xa8] ss:$16 sps:$4 sm:$0xff]  }
 0x6f6   : > { %3121 = vmatpush3.bf16.msra.mxu0 %v3348_v41  ;;  %3127 = vmatpush3.bf16.msra.mxu1 %v3349_v42  ;;  %v3378_v41 = vld [vmem:[#allocation17 + $0x88] ss:$16 sps:$4 sm:$0xff]   ;;  %v3383_v42 = vld [vmem:[#allocation17 + $0xa4] ss:$16 sps:$4 sm:$0xff]  }
 0x6f7   : > { %3128 = vmatprep.subr.bf16.mxu1 %v3936_v3  ;;  %3130 = vmatprep.mubr.msk.bf16.mxu1 %vm3937_vm0, %v3936_v3  ;;  %v3389_v46 = vld [vmem:[#allocation17 + $0xc4] ss:$16 sps:$4 sm:$0xff]  }
 0x6f8   : > { %2039 = vmatprep.subr.bf16.mxu0 %v3353_v10  ;;  %v3415_v10 = vld [vmem:[#allocation20 + $0x60] sm:$0xff]  }
 0x6fa   : > { %3129 = vmatpush3.bf16.msra.mxu1 %v3350_v47  ;;  %v3392_v47 = vld [vmem:[#allocation17 + $0xcc] ss:$16 sps:$4 sm:$0xff]  }
 0x6fb   : > { %2080 = vmatprep.subr.bf16.mxu1 %v3356_v20  ;;  %v3417_v20 = vld [vmem:[#allocation20 + $0x20] sm:$0xff]  }
 0x70e   : > { %v1491_v48 = vpop.f32.mrb[20].mxu0 }
 0x70f   : > { %v1547_v49 = vpack.c.bf16 %v1491_v48, %v1491_v48  ;;  %v3094_v50 = vpop.f32.mrb[21].mxu0  ;;  %v3387_v48 = vld [vmem:[#allocation17 + $0xc0] ss:$16 sps:$4 sm:$0xff]  }
 0x710   : > { %v1494_v51 = vpop.f32.mrb[22].mxu0  ;;  %v3393_v50 = vld [vmem:[#allocation17 + $0xe0] ss:$16 sps:$4 sm:$0xff]  }
 0x711   : > { %v3095_v52 = vpop.f32.mrb[23].mxu0  ;;  %3123 = vmatmul.mubr.msk.bf16.vlgmr.msra.gmra.mrb[28].mxu0 %vm1098_vm1, %v1547_v49  ;;  %v3390_v49 = vld [vmem:[#allocation17 + $0xc8] ss:$16 sps:$4 sm:$0xff]   ;;  %v3395_v51 = vld [vmem:[#allocation17 + $0xe4] ss:$16 sps:$4 sm:$0xff]  }
 0x712   : > { %v1539_v53 = vpop.f32.mrb[20].mxu1  ;;  %2040 = vmatpush1.bf16.msra.mxu0 %v3351_v9  ;;  %v3396_v52 = vld [vmem:[#allocation17 + $0xe8] ss:$16 sps:$4 sm:$0xff]   ;;  %v3414_v9 = vld [vmem:[#allocation20 + $0x98] sm:$0xff]  }
 0x713   : > { %v1548_v54 = vpack.c.bf16 %v1539_v53, %v1539_v53  ;;  %v3100_v55 = vpop.f32.mrb[21].mxu1  ;;  %2041 = vmatprep.subr.bf16.mxu0 %v3359_v21  ;;  %v3398_v53 = vld [vmem:[#allocation17 + $0xec] ss:$16 sps:$4 sm:$0xff]   ;;  %v3418_v21 = vld [vmem:[#allocation20 + $0xa0] sm:$0xff]  }
 0x714   : > { %v1542_v56 = vpop.f32.mrb[22].mxu1 }
 0x715   : > { %v3101_v57 = vpop.f32.mrb[23].mxu1  ;;  %3131 = vmatmul.mubr.msk.bf16.vlgmr.msra.gmra.mrb[28].mxu1 %vm1098_vm1, %v1548_v54  ;;  %v3940_v54 = vmov 0  }
 0x716   : > { %2081 = vmatpush1.bf16.msra.mxu1 %v3354_v19  ;;  %2042 = vmatpush1.bf16.msra.mxu0 %v3357_v24  ;;  %v3416_v19 = vld [vmem:[#allocation20 + $0xe0] sm:$0xff]   ;;  %v3420_v24 = vld [vmem:[#allocation20 + $0xe8] sm:$0xff]  }
 0x717   : > { %2082 = vmatprep.subr.bf16.mxu1 %v3362_v23  ;;  %2043 = vmatprep.subr.bf16.mxu0 %v3365_v26  ;;  %v3419_v23 = vld [vmem:[#allocation20 + $0x68] sm:$0xff]  }
 0x718   : > { %2071 = vmatprep.mubr.bf16.mxu0 %v3940_v54  ;;  %2112 = vmatprep.mubr.bf16.mxu1 %v3940_v54  ;;  %v3422_v26 = vld [vmem:[#allocation20 + $0xa8] sm:$0xff]  }
 0x71a   : > { %2083 = vmatpush1.bf16.msra.mxu1 %v3360_v25  ;;  %2044 = vmatpush1.bf16.msra.mxu0 %v3363_v28  ;;  %v3421_v25 = vld [vmem:[#allocation20 + $0x28] sm:$0xff]   ;;  %v3424_v28 = vld [vmem:[#allocation20 + $0xf0] sm:$0xff]  }
 0x71b   : > { %2084 = vmatprep.subr.bf16.mxu1 %v3368_v27  ;;  %2045 = vmatprep.subr.bf16.mxu0 %v3371_v34  ;;  %v3423_v27 = vld [vmem:[#allocation20 + $0x70] sm:$0xff]   ;;  %v3430_v34 = vld [vmem:[#allocation20 + $0xb8] sm:$0xff]  }
 0x71e   : > { %2085 = vmatpush1.bf16.msra.mxu1 %v3366_v29  ;;  %2046 = vmatpush1.bf16.msra.mxu0 %v3369_v36  ;;  %v3425_v29 = vld [vmem:[#allocation20 + $0x30] sm:$0xff]   ;;  %v1869_v36 = vsub.s32 2, %v4498_v22 }
 0x71f   : > { %2086 = vmatprep.subr.bf16.mxu1 %v3374_v35  ;;  %2047 = vmatprep.subr.bf16.mxu0 %v3377_v38  ;;  %v1861_v35 = vsub.s32 0, %v4498_v22  ;;  %v1865_v38 = vsub.s32 1, %v4498_v22 }
 0x722   : > { %2087 = vmatpush1.bf16.msra.mxu1 %v3372_v37  ;;  %2048 = vmatpush1.bf16.msra.mxu0 %v3375_v40  ;;  %v1857_v37 = vld [vmem:[#allocation19] sm:$0xf] }
 0x723   : > { %2088 = vmatprep.subr.bf16.mxu1 %v3380_v39  ;;  %2049 = vmatprep.subr.bf16.mxu0 %v3383_v42  ;;  %v1873_v39 = vsub.s32 3, %v4498_v22  ;;  %v1862_v40 = vrot.slane %v1857_v37, %v1861_v35  ;;  %v1866_v42 = vrot.slane %v1857_v37, %v1865_v38  ;;  %v2829_v35 = vld [vmem:[#allocation22] ss:$0 sm:$0xff] }
 0x726   : > { %2089 = vmatpush1.bf16.msra.mxu1 %v3378_v41  ;;  %2050 = vmatpush1.bf16.msra.mxu0 %v3381_v44  ;;  %v1870_v41 = vrot.slane %v1857_v37, %v1869_v36 }
 0x727   : > { %2090 = vmatprep.subr.bf16.mxu1 %v3386_v43  ;;  %2051 = vmatprep.subr.bf16.mxu0 %v3389_v46  ;;  %v1874_v43 = vrot.slane %v1857_v37, %v1873_v39 }
 0x72a   : > { %2091 = vmatpush1.bf16.msra.mxu1 %v3384_v45  ;;  %2052 = vmatpush1.bf16.msra.mxu0 %v3387_v48 }
 0x72b   : > { %2092 = vmatprep.subr.bf16.mxu1 %v3392_v47  ;;  %2053 = vmatprep.subr.bf16.mxu0 %v3395_v51 }
 0x72e   : > { %2093 = vmatpush1.bf16.msra.mxu1 %v3390_v49  ;;  %2054 = vmatpush1.bf16.msra.mxu0 %v3393_v50 }
 0x72f   : > { %2094 = vmatprep.subr.bf16.mxu1 %v3398_v53 }
 0x732   : > { %2095 = vmatpush1.bf16.msra.mxu1 %v3396_v52 }
 0x7c4   : > { %v1614_v58 = vpop.f32.mrb[24].mxu0 }
 0x7c5   : > { %v3108_v59 = vpop.f32.mrb[25].mxu0 }
 0x7c6   : > { %v1617_v60 = vpop.f32.mrb[26].mxu0  ;;  %v2795_v59 = vld [vmem:[#allocation14] ss:$0 sm:$0xff] }
 0x7c7   : > { %v3109_v61 = vpop.f32.mrb[27].mxu0 }
 0x7c8   : > { %v1669_v3 = vpop.f32.mrb[24].mxu1  ;;  %v2796_v61 = vld [vmem:[#allocation16] ss:$0 sm:$0xff] }
 0x7c9   : > { %v1785_v62 = vadd.f32 %v1669_v3, %v1614_v58  ;;  %v3116_v63 = vpop.f32.mrb[25].mxu1 }
 0x7ca   : > { %v1672_v0 = vpop.f32.mrb[26].mxu1 }
 0x7cb   : > { %v3117_v1 = vpop.f32.mrb[27].mxu1  ;;  %v3399_v0 = vld [vmem:[#allocation20 + $0x40] sm:$0xff]  }
 0x7cc   : > { %v3400_v1 = vld [vmem:[#allocation20 + $0xc0] sm:$0xff]   ;;  %2930 = vmatprep.subr.bf16.mxu0 %v3399_v0 }
 0x7cd   : > { %2952 = vmatprep.subr.bf16.mxu1 %v3400_v1 }
 0x7e4   : > { %v1724_v2 = vpop.f32.mrb[28].mxu0 }
 0x7e5   : > { %v1786_v4 = vadd.f32 %v1785_v62, %v1724_v2  ;;  %v3124_v5 = vpop.f32.mrb[29].mxu0  ;;  %v3401_v2 = vld [vmem:[#allocation20] sm:$0xff]  }
 0x7e6   : > { %v1727_v6 = vpop.f32.mrb[30].mxu0  ;;  %v3403_v5 = vld [vmem:[#allocation20 + $0x48] sm:$0xff]  }
 0x7e7   : > { %v3125_v7 = vpop.f32.mrb[31].mxu0  ;;  %v3404_v6 = vld [vmem:[#allocation20 + $0xc8] sm:$0xff]  }
 0x7e8   : > { %v1779_v8 = vpop.f32.mrb[28].mxu1  ;;  %v3405_v7 = vld [vmem:[#allocation20 + $0x8] sm:$0xff]  }
 0x7e9   : > { %v1787_v11 = vadd.f32 %v1786_v4, %v1779_v8  ;;  %v3132_v12 = vpop.f32.mrb[29].mxu1  ;;  %v3402_v4 = vld [vmem:[#allocation20 + $0x80] sm:$0xff]   ;;  %v3406_v8 = vld [vmem:[#allocation20 + $0x88] sm:$0xff]  }
 0x7ea   : > { %v1782_v13 = vpop.f32.mrb[30].mxu1  ;;  %v3408_v12 = vld [vmem:[#allocation20 + $0xd0] sm:$0xff]  }
 0x7eb   : > { %v1788_v16 = vadd.f32 %v3459_v15, %v1787_v11  ;;  %v3133_v17 = vpop.f32.mrb[31].mxu1  ;;  %v3407_v11 = vld [vmem:[#allocation20 + $0x50] sm:$0xff]   ;;  %v3411_v15 = vld [vmem:[#allocation20 + $0x58] sm:$0xff]  }
 0x7ec   : > { %v3409_v13 = vld [vmem:[#allocation20 + $0x10] sm:$0xff]   ;;  %v3413_v17 = vld [vmem:[#allocation20 + $0x18] sm:$0xff]  }
 0x7ed   : > { %v4560_v18 = vadd.f32 %v2794_v14, %v1788_v16  ;;  %v3410_v14 = vld [vmem:[#allocation20 + $0x90] sm:$0xff]   ;;  %v3412_v16 = vld [vmem:[#allocation20 + $0xd8] sm:$0xff]  }
 0x7ef   : > { %1799 = vadd.xlane.f32.xlu1 %v4560_v18 }
 0x87c   : > { %v1800_v30 = vpop.xlane.xlu1 %1799 }
 0x87d   : > { %v1801_v31 = vmul.f32 0.0078125, %v1800_v30  ;;  %v3426_v30 = vld [vmem:[#allocation20 + $0xb0] sm:$0xff]  }
 0x87f   : > { %v1802_v32 = vsub.f32 %v4560_v18, %v1801_v31  ;;  %v3427_v31 = vld [vmem:[#allocation20 + $0x78] sm:$0xff]  }
 0x881   : > { %v1803_v33 = vmul.f32 %v1802_v32, %v1802_v32 }
 0x883   : > { %1804 = vadd.xlane.f32.xlu0 %v1803_v33  ;;  %v3429_v33 = vld [vmem:[#allocation20 + $0x38] sm:$0xff]  }
 0x910   : > { %v1805_v55 = vpop.xlane.xlu0 %1804 }
 0x911   : > { %v1806_v56 = vmul.f32 0.0078125, %v1805_v55 }
 0x913   : > { %v1807_v57 = vadd.f32 1e-05, %v1806_v56 }
 0x915   : > { %3449 = vrsqrt.f32 %v1807_v57 }
 0x91f   : > { %v3450_v58 = vpop.eup %3449 }
 0x920   : > { %v1809_v60 = vmul.f32 %v3450_v58, %v1802_v32  ;;  %v3428_v32 = vld [vmem:[#allocation20 + $0xf8] sm:$0xff]  }
 0x922   : > { %v1816_v3 = vmul.f32 %v2795_v59, %v1809_v60 }
 0x924   : > { %v1823_v62 = vadd.f32 %v2796_v61, %v1816_v3 }
 0x926   : > { %v1824_v63 = vpack.c.bf16 %v1823_v62, %v1823_v62 }
 0x928   : > { %2072 = vmatmul.mubr.bf16.vlgmr.msra.gmra.mrb[32].mxu0 %v1824_v63  ;;  %2113 = vmatmul.mubr.bf16.vlgmr.msra.gmra.mrb[32].mxu1 %v1824_v63 }
 0x929   : > { %2931 = vmatpush3.bf16.msra.mxu0 %v3401_v2  ;;  %2953 = vmatpush3.bf16.msra.mxu1 %v3402_v4 }
 0x92a   : > { %2932 = vmatprep.subr.bf16.mxu0 %v3403_v5  ;;  %2954 = vmatprep.subr.bf16.mxu1 %v3404_v6 }
 0x92d   : > { %2933 = vmatpush3.bf16.msra.mxu0 %v3405_v7  ;;  %2955 = vmatpush3.bf16.msra.mxu1 %v3406_v8 }
 0x92e   : > { %2934 = vmatprep.subr.bf16.mxu0 %v3407_v11  ;;  %2956 = vmatprep.subr.bf16.mxu1 %v3408_v12 }
 0x931   : > { %2935 = vmatpush3.bf16.msra.mxu0 %v3409_v13  ;;  %2957 = vmatpush3.bf16.msra.mxu1 %v3410_v14 }
 0x932   : > { %2936 = vmatprep.subr.bf16.mxu0 %v3411_v15  ;;  %2958 = vmatprep.subr.bf16.mxu1 %v3412_v16 }
 0x935   : > { %2937 = vmatpush3.bf16.msra.mxu0 %v3413_v17  ;;  %2959 = vmatpush3.bf16.msra.mxu1 %v3414_v9 }
 0x936   : > { %2938 = vmatprep.subr.bf16.mxu0 %v3415_v10  ;;  %2960 = vmatprep.subr.bf16.mxu1 %v3416_v19 }
 0x939   : > { %2939 = vmatpush3.bf16.msra.mxu0 %v3417_v20  ;;  %2961 = vmatpush3.bf16.msra.mxu1 %v3418_v21 }
 0x93a   : > { %2940 = vmatprep.subr.bf16.mxu0 %v3419_v23  ;;  %2962 = vmatprep.subr.bf16.mxu1 %v3420_v24 }
 0x93d   : > { %2941 = vmatpush3.bf16.msra.mxu0 %v3421_v25  ;;  %2963 = vmatpush3.bf16.msra.mxu1 %v3422_v26 }
 0x93e   : > { %2942 = vmatprep.subr.bf16.mxu0 %v3423_v27  ;;  %2964 = vmatprep.subr.bf16.mxu1 %v3424_v28 }
 0x941   : > { %2943 = vmatpush3.bf16.msra.mxu0 %v3425_v29  ;;  %2965 = vmatpush3.bf16.msra.mxu1 %v3426_v30 }
 0x942   : > { %2944 = vmatprep.subr.bf16.mxu0 %v3427_v31  ;;  %2966 = vmatprep.subr.bf16.mxu1 %v3428_v32 }
 0x945   : > { %2945 = vmatpush3.bf16.msra.mxu0 %v3429_v33  ;;  %2967 = vmatpush3.bf16.msra.mxu1 %v3430_v34 }
 0x9fb   : > { %v2073_v44 = vpop.f32.mrb[32].mxu0  ;;  %v2114_v45 = vpop.f32.mrb[32].mxu1 }
 0x9fc   : > { %v2074_v46 = vadd.f32 %v2073_v44, %v1862_v40  ;;  %v2115_v47 = vadd.f32 %v2114_v45, %v1870_v41  ;;  %v2075_v48 = vpop.f32.mrb[33].mxu0  ;;  %v2116_v49 = vpop.f32.mrb[33].mxu1 }
 0x9fd   : > { %v2076_v50 = vadd.f32 %v2075_v48, %v1866_v42  ;;  %v2117_v51 = vadd.f32 %v2116_v49, %v1874_v43  ;;  %v2077_v52 = vpop.f32.mrb[34].mxu0  ;;  %v2118_v53 = vpop.f32.mrb[34].mxu1 }
 0x9fe   : > { %v2121_v54 = vmul.f32 %v2074_v46, %v2074_v46  ;;  %v2123_v55 = vmul.f32 %v2115_v47, %v2115_v47  ;;  %v2078_v56 = vpop.f32.mrb[35].mxu0  ;;  %v2119_v57 = vpop.f32.mrb[35].mxu1 }
 0x9ff   : > { %v2122_v58 = vmul.f32 %v2076_v50, %v2076_v50  ;;  %v2124_v22 = vmul.f32 %v2117_v51, %v2117_v51 }
 0xa00   : > { %v2125_v59 = vmul.f32 %v2121_v54, %v2074_v46  ;;  %v2127_v60 = vmul.f32 %v2123_v55, %v2115_v47 }
 0xa01   : > { %v2126_v61 = vmul.f32 %v2122_v58, %v2076_v50  ;;  %v2128_v3 = vmul.f32 %v2124_v22, %v2117_v51 }
 0xa02   : > { %v2129_v62 = vmul.f32 0.044715, %v2125_v59  ;;  %v2131_v63 = vmul.f32 0.044715, %v2127_v60 }
 0xa03   : > { %v2130_v0 = vmul.f32 0.044715, %v2126_v61  ;;  %v2132_v1 = vmul.f32 0.044715, %v2128_v3 }
 0xa04   : > { %v2133_v2 = vadd.f32 %v2129_v62, %v2074_v46  ;;  %v2135_v4 = vadd.f32 %v2131_v63, %v2115_v47 }
 0xa05   : > { %v2134_v5 = vadd.f32 %v2130_v0, %v2076_v50  ;;  %v2136_v6 = vadd.f32 %v2132_v1, %v2117_v51 }
 0xa06   : > { %v2137_v7 = vmul.f32 0.7978846, %v2133_v2  ;;  %v2139_v8 = vmul.f32 0.7978846, %v2135_v4 }
 0xa07   : > { %v2138_v11 = vmul.f32 0.7978846, %v2134_v5  ;;  %v2140_v12 = vmul.f32 0.7978846, %v2136_v6 }
 0xa08   : > { %3451 = vtanh.f32 %v2137_v7 }
 0xa09   : > { %3453 = vtanh.f32 %v2139_v8 }
 0xa0a   : > { %3455 = vtanh.f32 %v2138_v11 }
 0xa0b   : > { %3457 = vtanh.f32 %v2140_v12 }
 0xa12   : > { %v3452_v13 = vpop.eup %3451 }
 0xa13   : > { %v3454_v14 = vpop.eup %3453  ;;  %v2145_v15 = vadd.f32 1.0, %v3452_v13 }
 0xa14   : > { %v3456_v16 = vpop.eup %3455  ;;  %v2147_v17 = vadd.f32 1.0, %v3454_v14 }
 0xa15   : > { %v3458_v9 = vpop.eup %3457  ;;  %v2146_v10 = vadd.f32 1.0, %v3456_v16  ;;  %v2149_v19 = vmul.f32 0.5, %v2145_v15 }
 0xa16   : > { %v2148_v20 = vadd.f32 1.0, %v3458_v9  ;;  %v2151_v21 = vmul.f32 0.5, %v2147_v17 }
 0xa17   : > { %v2150_v23 = vmul.f32 0.5, %v2146_v10  ;;  %v2153_v25 = vmul.f32 %v2149_v19, %v2074_v46 }
 0xa18   : > { %v2152_v24 = vmul.f32 0.5, %v2148_v20  ;;  %v2155_v27 = vmul.f32 %v2151_v21, %v2115_v47 }
 0xa19   : > { %v2154_v26 = vmul.f32 %v2150_v23, %v2076_v50  ;;  %v2157_v31 = vpack.c.bf16 %v2153_v25, %v2153_v25 }
 0xa1a   : > { %v2156_v28 = vmul.f32 %v2152_v24, %v2117_v51  ;;  %v2159_v32 = vpack.c.bf16 %v2155_v27, %v2155_v27 }
 0xa1b   : > { %v2158_v29 = vpack.c.bf16 %v2154_v26, %v2154_v26 }
 0xa1c   : > { %v2160_v30 = vpack.c.bf16 %v2156_v28, %v2156_v28 }
 0xa1d   : > { %2456 = vmatprep.mubr.bf16.mxu0 %v2158_v29 }
 0xa1e   : > { %2496 = vmatprep.mubr.bf16.mxu1 %v2160_v30  ;;  %2457 = vmatmul.mubr.bf16.vlgmr.msra.gmra.mrb[36].mxu0 %v2157_v31 }
 0xa1f   : > { %2497 = vmatmul.mubr.bf16.vlgmr.msra.gmra.mrb[36].mxu1 %v2159_v32 }
 0xaf1   : > { %v2946_v33 = vpop.f32.mrb[36].mxu0 }
 0xaf2   : > { %v2968_v34 = vpop.f32.mrb[36].mxu1  ;;  %v2947_v36 = vpop.f32.mrb[37].mxu0 }
 0xaf3   : > { %v2948_v37 = vadd.f32 %v2947_v36, %v2946_v33  ;;  %v2969_v38 = vpop.f32.mrb[37].mxu1  ;;  %v2949_v39 = vpop.f32.mrb[38].mxu0 }
 0xaf4   : > { %v2970_v40 = vadd.f32 %v2969_v38, %v2968_v34  ;;  %v2971_v41 = vpop.f32.mrb[38].mxu1  ;;  %v2950_v42 = vpop.f32.mrb[39].mxu0 }
 0xaf5   : > { %v2459_v43 = vadd.f32 %v2948_v37, %v2829_v35  ;;  %v2972_v44 = vpop.f32.mrb[39].mxu1 }
 0xaf7   : > { %v2499_v45 = vadd.f32 %v2970_v40, %v2459_v43 }
 0xaf9   : > { %v2504_v46 = vadd.f32 %v2499_v45, %v4560_v18 }
 0xafb   : > { %2505 = vst [vmem:[%s615_s19] sm:$0xff] %v2504_v46 }
 0xafc   : > { %3839 = shalt.err (!%p3836_p9)
}
 0xafd   : > { %s3840_s1 = scalar_lea.hbm %s4575_s21, 128  ;;  %s3844_s19 = scalar_lea.hbm %s4677_s23, 256 }
 0xafe   : > { %p3841_p7 = scmp.ne.s32.totalorder %s4575_s21, %s3840_s1  ;;  %p3845_p13 = scmp.lt.u32.totalorder %s4575_s21, %s4677_s23 }
 0xaff   : > { %p3846_p3 = scmp.lt.u32.totalorder %s3844_s19, %s3840_s1  ;;  %p3848_p2 = scmp.lt.u32.totalorder %s3840_s1, %s4575_s21 }
 0xb00   : > { %p3842_p10 = pnand %p3841_p7, %p4678_p1 }
 0xb01   : > { %p3847_p0 = por %p3846_p3, %p3845_p13 }
 0xb02   : > { %p3843_p4 = pneg %p3842_p10 }
 0xb03   : > { %p3849_p6 = por %p3848_p2, %p3847_p0 }
 0xb05   : > { %p3850_p11 = pnand %p3849_p6, %p3843_p4 }
 0xb07   : > { %3853 = shalt.err (!%p3850_p11)
}
 0xb08   : > { %3184 = dma.vmem_to_hbm [thread:$0]  (%p4678_p1), %s4577_s16, 128, %s4575_s21, %s2507_s29  }
 0xb09 PF: > { %s2532_s20 = sand.u32 1, %s3904_s25   ;;  %p4679_p12 = scmp.ne.s32.totalorder %s4660_s17, 0 }
 0xb0a   : > { %p4680_p8 = scmp.ge.s32.totalorder %s3916_s28, 2  ;;  %s2533_s14 = scalar_lea.sflag [#allocation4], %s2532_s20 }
 0xb0c   : > { %p3228_p5 = pnand %p4680_p8, %p4679_p12 }
 0xb0e   : > { %3899 = dma.done.wait (!%p3228_p5), %s2533_s14, 128  }
 0xb0f   : > { %3901 = vsyncadd (!%p3228_p5), %s2533_s14, 4294967168  ;;  %p32_p9 = scmp.ge.s32.totalorder %s4309_s18, 4   ;;  %s4681_s25 = smov %s3908_s26 }
 0xb10   : > { %s4682_s26 = smov %s3912_s27  ;;  %s4683_s27 = smov %s4321_s30 }
 0xb11   : > { %s4684_s28 = smov %s4309_s18  ;;  %34 = sbr.rel (!%p32_p9) target bundleno = 18 (0x12), region = 165 }
 0xb18   :  { %2538 = vsyncpa [#allocation3], 1 }
 0xb19   :  { %2540 = vsyncpa [#allocation3 + $0x1], 1 }
 0xb1a   :  { %2541 = vsyncpa [#allocation6], 1 }
 0xb1b   :  { %2542 = vsyncpa [#allocation9], 1 }
 0xb1c   :  { %2543 = vsyncpa [#allocation12], 1 }
 0xb1d   :  { %2544 = vsyncpa [#allocation15], 1 }
 0xb1e   :  { %2545 = vsyncpa [#allocation18], 1 }
 0xb1f   :  { %2546 = vsyncpa [#allocation21], 1 }
 0xb20   :  { %2547 = vsyncpa [#allocation4], 1 }
 0xb21   :  { %2549 = vsyncpa [#allocation4 + $0x1], 1 }

</bundles_post_ra>
